<compile_context>
chip_gen: v7x
topology: tpu7x:2x2x1
jax: 0.10.0
libtpu: 0.0.40
codegen_flags: <defaults>
</compile_context>

<pallas_src>
import numpy as np
import jax
import jax.numpy as jnp
from jax.experimental import pallas as pl
from jax.experimental.pallas import tpu as pltpu

VMEM_SPEC = pl.BlockSpec(memory_space=pltpu.MemorySpace.VMEM)
LANES = 128


# ------------------------------------------------------------------ slab packer
class _Slab:
    """Row-packed [R, 128] f32 slab; every block starts at an 8-aligned row."""

    def __init__(self, width=LANES):
        self.width = width
        self.blocks = []
        self.offs = {}
        self.rows = 0

    def add(self, name, arr):
        arr = np.asarray(arr, np.float32)
        if arr.ndim == 1:
            arr = arr[None, :]
        r, c = arr.shape
        assert c <= self.width, (name, arr.shape)
        blk = np.zeros((-(-r // 8) * 8, self.width), np.float32)
        blk[:r, :c] = arr
        self.offs[name] = (self.rows, r, c)
        self.blocks.append(blk)
        self.rows += blk.shape[0]

    def build(self):
        return jnp.asarray(np.concatenate(self.blocks, axis=0)), dict(self.offs)


# ------------------------------------------------------------------ fused kernel
def _make_kernel(meta):
    NP, EP, BP = meta['NP'], meta['EP'], meta['BP']
    A, H, dout = meta['A'], meta['H'], meta['dout']
    din_n, din_u = meta['din_n'], meta['din_u']
    mid_pair = meta['mid_pair']
    goffs, poffs = meta['goffs'], meta['poffs']
    f32 = jnp.float32

    def kernel(data_ref, g_ref, p_ref, node_out, graph_out):
        dot = lambda a, b: jnp.dot(a, b, preferred_element_type=f32)
        relu = lambda x: jnp.maximum(x, 0.0)

        def G(name):
            r, nr, nc = goffs[name]
            return g_ref[r:r + nr, 0:nc]

        def P(name):
            r, nr, nc = poffs[name]
            return p_ref[r:r + nr, 0:nc]

        nd = data_ref[0:NP, :]                              # one full-width load
        x_n = nd[:, 0:din_n]
        h_both = nd[:, din_n:din_n + 2 * H]                 # [h0u | h0]
        c_both = nd[:, din_n + 2 * H:din_n + 4 * H]         # [c0u | c0]
        g_repr = data_ref[NP:NP + BP, 0:din_u]

        nge = G('nge')            # [NP+EP, BP]  node->graph stacked over edge->graph
        srcdst = G('srcdst')      # [2EP, NP]    edge->src stacked over edge->dst
        edstT = G('edstT')        # [NP, EP]     segment-sum over dst
        fsel = G('fsel')          # [BP, NP]     first node of each graph

        # obs = cat(node_feat, g_repr[graph(node)]) handled via weight-row split.
        add_obs = dot(nge[0:NP], g_repr)                    # [NP, din_u]

        # -- merged (utility | opponent-theta) front-end: mlp1a/1b, LSTM, mlp2/mlp1
        hid1 = relu(dot(x_n, P('W1a_n')) + dot(add_obs, P('W1a_g')) + P('b1a'))
        x_both = dot(hid1, P('W1b')) + P('b1b')             # [NP, 2*dmid] = [xu | xm]
        gates = dot(x_both, P('Wih')) + dot(h_both, P('Whh')) + P('b_lstm')
        i_g = jax.nn.sigmoid(gates[:, 0:2 * H])
        f_g = jax.nn.sigmoid(gates[:, 2 * H:4 * H])
        g_g = jnp.tanh(gates[:, 4 * H:6 * H])
        o_g = jax.nn.sigmoid(gates[:, 6 * H:8 * H])
        c_new = f_g * c_both + i_g * g_g                    # [c1u | c1]
        h_new = o_g * jnp.tanh(c_new)                       # [h1u | h1]
        halfnf = dot(relu(h_new), P('W2')) + P('b2')        # [NP, 2*dout] = [half | nf]

        # -- fused one-hot gathers --
        first_u = dot(fsel, halfnf[:, 0:dout])              # [BP, dout]
        first_ge = dot(nge, first_u)                        # broadcast to nodes+edges
        first_n = first_ge[0:NP]                            # [NP, dout]
        first_e = first_ge[NP:NP + EP]                      # [EP, dout]
        sd = dot(srcdst, halfnf)                            # [2EP, 2*dout]
        nf_src = sd[0:EP, dout:2 * dout]
        nf_dst = sd[EP:2 * EP, dout:2 * dout]

        # -- OppoModelNet, mode='theta' (RFMBlock; zero-width edge/g inputs drop) --
        # TODO(synk): RFMBlock_theta's global-u head (fc_u/fc_u2) is unused by
        # the LSTMMRF inference path and intentionally not computed here.
        e_new = dot(relu(dot(nf_src, P('fe_wa')) + dot(nf_dst, P('fe_wb')) + P('fe_b')),
                    P('fe2_w')) + P('fe2_b')                # [EP, dlast]
        h_agg = dot(edstT, e_new)                           # segment-sum over dst
        nf_feat = halfnf[:, dout:2 * dout]
        n_new = dot(relu(dot(nf_feat, P('fn_wa')) + dot(h_agg, P('fn_wb')) + P('fn_b')),
                    P('fn2_w')) + P('fn2_b')
        act_logits = dot(relu(dot(n_new, P('ro_w')) + P('ro_b')),
                         P('ro2_w')) + P('ro2_b')           # [NP, A]
        mx = jnp.max(act_logits, axis=-1, keepdims=True)
        ex = jnp.exp(act_logits - mx)
        node_probs = ex * pl.reciprocal(jnp.sum(ex, axis=-1, keepdims=True),
                                        approx=True)

        # -- UtilLayer, inference mode, pair_comp='avg' --
        indiv_util = dot(
            relu(dot(relu(dot(halfnf[:, 0:dout], P('iu1_wa')) +
                          dot(first_n, P('iu1_wb')) + P('iu1_b')),
                     P('iu3_w')) + P('iu3_b')),
            P('iu2_w')) + P('iu2_b')                        # [NP, A]

        # ju1 for U / Ur from one stacked matmul; ju3/ju2 on the stacked batch.
        sab = dot(sd[:, 0:dout], P('ju1_ab'))               # [2EP, 2*mid_pair]
        s_a = sab[0:EP, 0:mid_pair]
        s_b = sab[0:EP, mid_pair:2 * mid_pair]
        d_a = sab[EP:2 * EP, 0:mid_pair]
        d_b = sab[EP:2 * EP, mid_pair:2 * mid_pair]
        f_c = dot(first_e, P('ju1_wc')) + P('ju1_b')
        pre = jnp.concatenate([s_a + d_b + f_c, d_a + s_b + f_c], axis=0)
        uu = dot(relu(dot(relu(pre), P('ju3_w')) + P('ju3_b')),
                 P('ju2_w')) + P('ju2_b')                   # [2EP, A*A]
        u_flat = uu[0:EP]        # U[e, i, j]  at lane i*A + j
        ur_flat = uu[EP:2 * EP]  # Ur[e, i, j] at lane i*A + j

        # util_vals[e] = (U[e]^T + Ur[e]) / 2, kept flattened on lanes.
        sd_probs = dot(srcdst, node_probs)                  # [2EP, A]
        src_prob = sd_probs[0:EP]
        dst_prob = sd_probs[EP:2 * EP]
        src_rep = dot(src_prob, G('p_outer_t'))             # src[p] at lane p*A+q
        src_til = dot(src_prob, G('p_inner_t'))             # src[q] at lane p*A+q
        u_message = 0.5 * (dot(u_flat * src_rep, G('p_inner')) +
                           dot(ur_flat * src_til, G('p_outer')))              # [EP, A]
        edge_all_sum = jnp.sum(u_message * dst_prob, axis=-1, keepdims=True)  # [EP, 1]
        util_dst = dot(edstT, u_message)                    # [NP, A]
        expected_indiv = jnp.sum(indiv_util * node_probs, axis=-1, keepdims=True)

        total_connected = dot(fsel, util_dst)               # [BP, A]
        total_n_connected = dot(G('esum_nc'), edge_all_sum)
        # TODO(synk): dgl.sum_nodes of the rank-1 'expected_indiv_util' feature
        # with a [N,1] weight is shape-ambiguous in the reference; implemented
        # as the intended weighted per-graph sum (same as prior translation).
        total_expected_others = dot(G('nsum_mw'), expected_indiv)
        total_indiv_zero = dot(fsel, indiv_util)
        out = total_connected + total_n_connected + (total_expected_others +
                                                     total_indiv_zero)

        # -- lane-packed output slabs (no redundant full-tile zero store) --
        node_out[:, 0:A] = act_logits
        node_out[:, A:A + 2 * H] = h_new                    # [h1u | h1]
        node_out[:, A + 2 * H:A + 4 * H] = c_new            # [c1u | c1]
        node_out[:, A + 4 * H:LANES] = jnp.zeros((NP, LANES - A - 4 * H), f32)
        graph_out[:, 0:A] = out
        graph_out[:, A:LANES] = jnp.zeros((BP, LANES - A), f32)

    return kernel


# ------------------------------------------------------------------ params / graph
def linear_params(key, d_in, d_out, scale=0.1):
    kw, kb = jax.random.split(key)
    w = (jax.random.normal(kw, (d_in, d_out)) * scale).astype(jnp.float32)
    b = (jax.random.normal(kb, (1, d_out)) * scale).astype(jnp.float32)
    return w, b


def lstm_params(key, d_in, hid, scale=0.1):
    k1, k2, k3 = jax.random.split(key, 3)
    wih = (jax.random.normal(k1, (d_in, 4 * hid)) * scale).astype(jnp.float32)
    whh = (jax.random.normal(k2, (hid, 4 * hid)) * scale).astype(jnp.float32)
    b = (jax.random.normal(k3, (1, 4 * hid)) * scale).astype(jnp.float32)  # b_ih + b_hh
    return wih, whh, b


def init_params(key, dims):
    (din_n, din_u, hid, H, dmid, dout, A, dlast, rfm_hid, last_hid,
     mid_pair, mid_nodes) = dims
    p = {}

    def nxt():
        nonlocal key
        key, sub = jax.random.split(key)
        return sub

    # LSTMMRF own layers (utility branch)
    p['u_mlp1a'] = linear_params(nxt(), din_n + din_u, hid)
    p['u_mlp1b'] = linear_params(nxt(), hid, dmid)
    p['u_lstm2'] = lstm_params(nxt(), dmid, H)
    p['u_mlp2'] = linear_params(nxt(), H, dout)
    # UtilLayer (pair_comp='avg')
    p['ju1'] = linear_params(nxt(), 3 * dout, mid_pair)
    p['ju3'] = linear_params(nxt(), mid_pair, mid_pair)
    p['ju2'] = linear_params(nxt(), mid_pair, A * A)
    p['iu1'] = linear_params(nxt(), 2 * dout, mid_nodes)
    p['iu3'] = linear_params(nxt(), mid_nodes, mid_nodes)
    p['iu2'] = linear_params(nxt(), mid_nodes, A)
    # OppoModelNet (theta path)
    p['mlp1a'] = linear_params(nxt(), din_n + din_u, hid)
    p['mlp1b'] = linear_params(nxt(), hid, dmid)
    p['lstm1'] = lstm_params(nxt(), dmid, H)
    p['mlp1'] = linear_params(nxt(), H, dout)
    p['mlp1_readout'] = linear_params(nxt(), dlast, last_hid)
    p['mlp1_readout2'] = linear_params(nxt(), last_hid, A)
    # RFMBlock theta (fc_u/fc_u2 omitted: unused by the inference path)
    p['fc_edge'] = linear_params(nxt(), 2 * dout, rfm_hid)
    p['fc_edge2'] = linear_params(nxt(), rfm_hid, dlast)
    p['fc_node'] = linear_params(nxt(), dout + dlast, rfm_hid)
    p['fc_node2'] = linear_params(nxt(), rfm_hid, dlast)
    p['act_dims'] = A
    return p


def build_graph(B, n, act_dims):
    """Batch of B fully-connected directed graphs with n nodes each, as dense
    (row-padded) one-hot gather/scatter/weighting matrices (numpy)."""
    N = B * n
    m = n * (n - 1)
    E = B * m
    rup = lambda x, k: ((x + k - 1) // k) * k
    NP, EP, BP = rup(N, 8), rup(E, 8), rup(B, 8)

    src, dst = [], []
    for b in range(B):
        for i in range(n):
            for j in range(n):
                if i != j:
                    src.append(b * n + i)
                    dst.append(b * n + j)
    src_a = np.asarray(src, np.int32)
    dst_a = np.asarray(dst, np.int32)

    n2g = np.zeros((NP, BP), np.float32)
    n2g[np.arange(N), np.arange(N) // n] = 1.0
    e2g = np.zeros((EP, BP), np.float32)
    e2g[np.arange(E), np.arange(E) // m] = 1.0
    esrc = np.zeros((EP, NP), np.float32)
    esrc[np.arange(E), src_a] = 1.0
    edst = np.zeros((EP, NP), np.float32)
    edst[np.arange(E), dst_a] = 1.0
    first_sel = np.zeros((BP, NP), np.float32)
    first_sel[np.arange(B), np.arange(B) * n] = 1.0
    nsum_mw = np.zeros((BP, NP), np.float32)          # per-graph sum over non-first nodes
    for i in range(N):
        if i % n != 0:
            nsum_mw[i // n, i] = 1.0
    esum_nc = np.zeros((BP, EP), np.float32)          # 0.5 weight on edges w/o a first endpoint
    for e in range(E):
        if (src[e] % n != 0) and (dst[e] % n != 0):
            esum_nc[e // m, e] = 0.5

    A = act_dims
    p_inner = np.zeros((A * A, A), np.float32)        # flat k = p*A+q -> q
    p_outer = np.zeros((A * A, A), np.float32)        # flat k = p*A+q -> p
    for pp in range(A):
        for q in range(A):
            p_inner[pp * A + q, q] = 1.0
            p_outer[pp * A + q, pp] = 1.0

    return dict(B=B, n=n, m=m, N=N, E=E, NP=NP, EP=EP, BP=BP,
                src=src_a, dst=dst_a,
                node2graph=(np.arange(N) // n).astype(np.int32),
                edge2graph=(np.arange(E) // m).astype(np.int32),
                first_nodes=(np.arange(B) * n).astype(np.int32),
                n2g=n2g, e2g=e2g, esrc=esrc, edst=edst,
                first_sel=first_sel, nsum_mw=nsum_mw, esum_nc=esum_nc,
                p_inner=p_inner, p_outer=p_outer)


# ------------------------------------------------------------------ offline packing
def pack_model(params, graph, dims):
    (din_n, din_u, hid, H, dmid, dout, A, dlast, rfm_hid, last_hid,
     mid_pair, mid_nodes) = dims
    NP, EP, BP = graph['NP'], graph['EP'], graph['BP']

    assert 2 * hid <= LANES and 8 * H <= LANES and 2 * dmid <= LANES
    assert 2 * dout <= LANES and 2 * mid_pair <= LANES and A * A <= LANES
    assert din_n + 4 * H <= LANES and A + 4 * H <= LANES and din_u <= LANES

    # ---- constant graph-structure slab ----
    gs = _Slab()
    gs.add('nge', np.concatenate([graph['n2g'], graph['e2g']], axis=0))
    gs.add('srcdst', np.concatenate([graph['esrc'], graph['edst']], axis=0))
    gs.add('edstT', graph['edst'].T)
    gs.add('fsel', graph['first_sel'])
    gs.add('nsum_mw', graph['nsum_mw'])
    gs.add('esum_nc', graph['esum_nc'])
    gs.add('p_inner', graph['p_inner'])
    gs.add('p_outer', graph['p_outer'])
    gs.add('p_inner_t', graph['p_inner'].T)
    gs.add('p_outer_t', graph['p_outer'].T)
    gslab, goffs = gs.build()

    f = lambda x: np.asarray(x, np.float32)
    u1a_w, u1a_b = map(f, params['u_mlp1a'])
    m1a_w, m1a_b = map(f, params['mlp1a'])
    u1b_w, u1b_b = map(f, params['u_mlp1b'])
    m1b_w, m1b_b = map(f, params['mlp1b'])
    u_wih, u_whh, u_lb = map(f, params['u_lstm2'])
    m_wih, m_whh, m_lb = map(f, params['lstm1'])
    u2_w, u2_b = map(f, params['u_mlp2'])
    m1_w, m1_b = map(f, params['mlp1'])
    fe_w, fe_b = map(f, params['fc_edge'])
    fe2_w, fe2_b = map(f, params['fc_edge2'])
    fn_w, fn_b = map(f, params['fc_node'])
    fn2_w, fn2_b = map(f, params['fc_node2'])
    ro_w, ro_b = map(f, params['mlp1_readout'])
    ro2_w, ro2_b = map(f, params['mlp1_readout2'])
    iu1_w, iu1_b = map(f, params['iu1'])
    iu3_w, iu3_b = map(f, params['iu3'])
    iu2_w, iu2_b = map(f, params['iu2'])
    ju1_w, ju1_b = map(f, params['ju1'])
    ju3_w, ju3_b = map(f, params['ju3'])
    ju2_w, ju2_b = map(f, params['ju2'])

    # ---- merged two-branch front-end weights: 'u' branch lanes | 'm' branch lanes ----
    W1a_n = np.concatenate([u1a_w[:din_n], m1a_w[:din_n]], axis=1)
    W1a_g = np.concatenate([u1a_w[din_n:], m1a_w[din_n:]], axis=1)
    b1a = np.concatenate([u1a_b, m1a_b], axis=1)
    W1b = np.zeros((2 * hid, 2 * dmid), np.float32)
    W1b[:hid, :dmid] = u1b_w
    W1b[hid:, dmid:] = m1b_w
    b1b = np.concatenate([u1b_b, m1b_b], axis=1)
    # merged LSTM, gate lane layout [i_u|i_m, f_u|f_m, g_u|g_m, o_u|o_m]
    Wih = np.zeros((2 * dmid, 8 * H), np.float32)
    Whh = np.zeros((2 * H, 8 * H), np.float32)
    b_l = np.zeros((1, 8 * H), np.float32)
    for k in range(4):
        Wih[:dmid, 2 * k * H:(2 * k + 1) * H] = u_wih[:, k * H:(k + 1) * H]
        Wih[dmid:, (2 * k + 1) * H:(2 * k + 2) * H] = m_wih[:, k * H:(k + 1) * H]
        Whh[:H, 2 * k * H:(2 * k + 1) * H] = u_whh[:, k * H:(k + 1) * H]
        Whh[H:, (2 * k + 1) * H:(2 * k + 2) * H] = m_whh[:, k * H:(k + 1) * H]
        b_l[:, 2 * k * H:(2 * k + 1) * H] = u_lb[:, k * H:(k + 1) * H]
        b_l[:, (2 * k + 1) * H:(2 * k + 2) * H] = m_lb[:, k * H:(k + 1) * H]
    W2 = np.zeros((2 * H, 2 * dout), np.float32)
    W2[:H, :dout] = u2_w
    W2[H:, dout:] = m1_w
    b2 = np.concatenate([u2_b, m1_b], axis=1)

    ps = _Slab()
    for name, arr in [
        ('W1a_n', W1a_n), ('W1a_g', W1a_g), ('b1a', b1a),
        ('W1b', W1b), ('b1b', b1b),
        ('Wih', Wih), ('Whh', Whh), ('b_lstm', b_l),
        ('W2', W2), ('b2', b2),
        ('fe_wa', fe_w[:dout]), ('fe_wb', fe_w[dout:]), ('fe_b', fe_b),
        ('fe2_w', fe2_w), ('fe2_b', fe2_b),
        ('fn_wa', fn_w[:dout]), ('fn_wb', fn_w[dout:]), ('fn_b', fn_b),
        ('fn2_w', fn2_w), ('fn2_b', fn2_b),
        ('ro_w', ro_w), ('ro_b', ro_b), ('ro2_w', ro2_w), ('ro2_b', ro2_b),
        ('iu1_wa', iu1_w[:dout]), ('iu1_wb', iu1_w[dout:]), ('iu1_b', iu1_b),
        ('iu3_w', iu3_w), ('iu3_b', iu3_b), ('iu2_w', iu2_w), ('iu2_b', iu2_b),
        ('ju1_ab', np.concatenate([ju1_w[:dout], ju1_w[dout:2 * dout]], axis=1)),
        ('ju1_wc', ju1_w[2 * dout:]), ('ju1_b', ju1_b),
        ('ju3_w', ju3_w), ('ju3_b', ju3_b), ('ju2_w', ju2_w), ('ju2_b', ju2_b),
    ]:
        ps.add(name, arr)
    pslab, poffs = ps.build()

    meta = dict(N=graph['N'], B=graph['B'], NP=NP, EP=EP, BP=BP,
                A=A, H=H, dout=dout, din_n=din_n, din_u=din_u,
                mid_pair=mid_pair, goffs=goffs, poffs=poffs)
    return dict(gslab=gslab, pslab=pslab, meta=meta, kernel=_make_kernel(meta))


# ------------------------------------------------------------------ forward (wrapper)
def lstm_mrf_forward(packed, node_feat, g_repr, hidden_n, hidden_n_u):
    m = packed['meta']
    N, B, NP, BP = m['N'], m['B'], m['NP'], m['BP']
    A, H, din_u = m['A'], m['H'], m['din_u']
    f32 = jnp.float32

    # Per-call data slab: rows 0:NP = [node_feat | h0u | h0 | c0u | c0],
    # rows NP:NP+BP = [g_repr].  Everything else is pre-packed at init.
    node_block = jnp.concatenate(
        [node_feat.astype(f32), hidden_n_u[0][0].astype(f32),
         hidden_n[0][0].astype(f32), hidden_n_u[1][0].astype(f32),
         hidden_n[1][0].astype(f32)], axis=1)
    node_block = jnp.pad(node_block,
                         ((0, NP - N), (0, LANES - node_block.shape[1])))
    graph_block = jnp.pad(g_repr.astype(f32), ((0, BP - B), (0, LANES - din_u)))
    data_slab = jnp.concatenate([node_block, graph_block], axis=0)

    node_slab, graph_slab = pl.pallas_call(
        packed['kernel'],
        out_shape=(jax.ShapeDtypeStruct((NP, LANES), f32),
                   jax.ShapeDtypeStruct((BP, LANES), f32)),
        in_specs=[VMEM_SPEC, VMEM_SPEC, VMEM_SPEC],
        out_specs=(VMEM_SPEC, VMEM_SPEC),
    )(data_slab, packed['gslab'], packed['pslab'])

    act_logits = node_slab[:N, 0:A]
    h1u = node_slab[:N, A:A + H]
    h1 = node_slab[:N, A + H:A + 2 * H]
    c1u = node_slab[:N, A + 2 * H:A + 3 * H]
    c1 = node_slab[:N, A + 3 * H:A + 4 * H]
    out = graph_slab[:B, 0:A]
    return out, act_logits, (h1[None], c1[None]), (h1u[None], c1u[None])


# ------------------------------------------------------------------ pure-JAX reference
def reference_forward(p, graph, node_feat, g_repr, hidden_n, hidden_n_u):
    B, n, m = graph['B'], graph['n'], graph['m']
    N = B * n
    src, dst = graph['src'], graph['dst']
    node2graph, edge2graph = graph['node2graph'], graph['edge2graph']
    first_nodes = graph['first_nodes']
    A = p['act_dims']

    lin = lambda x, wb: x @ wb[0] + wb[1]
    mlp2 = lambda x, pa, pb: lin(jnp.maximum(lin(x, pa), 0.0), pb)
    mlp3 = lambda x, pa, pb, pc: lin(
        jnp.maximum(lin(jnp.maximum(lin(x, pa), 0.0), pb), 0.0), pc)

    def lstm(x, h, c, prm):
        wih, whh, b = prm
        g = x @ wih + h @ whh + b
        H = h.shape[-1]
        i = jax.nn.sigmoid(g[:, :H]); f = jax.nn.sigmoid(g[:, H:2 * H])
        gg = jnp.tanh(g[:, 2 * H:3 * H]); o = jax.nn.sigmoid(g[:, 3 * H:4 * H])
        cn = f * c + i * gg
        return o * jnp.tanh(cn), cn

    obs = jnp.concatenate([node_feat, g_repr[node2graph]], -1)
    xu = mlp2(obs, p['u_mlp1a'], p['u_mlp1b'])
    h1u, c1u = lstm(xu, hidden_n_u[0][0], hidden_n_u[1][0], p['u_lstm2'])
    half = lin(jnp.maximum(h1u, 0.0), p['u_mlp2'])
    first_u = half[first_nodes]
    n_feat_u = jnp.concatenate([half, first_u[node2graph]], -1)
    e_src, e_dst = half[src], half[dst]
    add_first_e = first_u[edge2graph]
    e_feat_u = jnp.concatenate([e_src, e_dst, add_first_e], -1)
    rev_feat_u = jnp.concatenate([e_dst, e_src, add_first_e], -1)

    xm = mlp2(obs, p['mlp1a'], p['mlp1b'])
    h1, c1 = lstm(xm, hidden_n[0][0], hidden_n[1][0], p['lstm1'])
    nf = lin(jnp.maximum(h1, 0.0), p['mlp1'])
    e_new = mlp2(jnp.concatenate([nf[src], nf[dst]], -1), p['fc_edge'], p['fc_edge2'])
    h_agg = jax.ops.segment_sum(e_new, dst, num_segments=N)
    n_new = mlp2(jnp.concatenate([nf, h_agg], -1), p['fc_node'], p['fc_node2'])
    act_logits = mlp2(n_new, p['mlp1_readout'], p['mlp1_readout2'])
    node_probs = jax.nn.softmax(act_logits, -1)

    indiv_util = mlp3(n_feat_u, p['iu1'], p['iu3'], p['iu2'])
    U = mlp3(e_feat_u, p['ju1'], p['ju3'], p['ju2']).reshape(-1, A, A)
    Ur = mlp3(rev_feat_u, p['ju1'], p['ju3'], p['ju2']).reshape(-1, A, A)
    util_vals = jnp.transpose((U + jnp.transpose(Ur, (0, 2, 1))) / 2.0, (0, 2, 1))
    src_prob, dst_prob = node_probs[src], node_probs[dst]
    edge_all_sum = jnp.einsum('eij,ei,ej->e', util_vals, dst_prob, src_prob)[:, None]
    u_message = jnp.einsum('eij,ej->ei', util_vals, src_prob)
    util_dst = jax.ops.segment_sum(u_message, dst, num_segments=N)
    expected_indiv = (indiv_util * node_probs).sum(-1)
    is_first = (jnp.arange(N) % n) == 0
    w = is_first.astype(jnp.float32)[:, None]
    mw = 1.0 - w
    nc_w = jnp.where(is_first[src] | is_first[dst], 0.0, 0.5)[:, None]
    total_connected = (util_dst * w).reshape(B, n, A).sum(1)
    total_n_connected = (edge_all_sum * nc_w).reshape(B, m, 1).sum(1)
    total_expected_others = (expected_indiv[:, None] * mw).reshape(B, n, 1).sum(1)
    total_indiv_zero = (indiv_util * w).reshape(B, n, A).sum(1)
    out = total_connected + total_n_connected + (total_expected_others + total_indiv_zero)
    return out, act_logits, (h1[None], c1[None]), (h1u[None], c1u[None])


# ------------------------------------------------------------------ main
if __name__ == "__main__":
    B, n_nodes = 2, 3
    dim_in_node, dim_in_u = 10, 5
    hidden_dim, dim_lstm_out, dim_mid, dim_out = 32, 16, 16, 12
    act_dims, dim_last = 5, 8
    f_rfm_hidden_dim, f_last_hidden = 32, 16
    mid_pair, mid_nodes = 32, 32

    dims = (dim_in_node, dim_in_u, hidden_dim, dim_lstm_out, dim_mid, dim_out,
            act_dims, dim_last, f_rfm_hidden_dim, f_last_hidden,
            mid_pair, mid_nodes)

    key = jax.random.PRNGKey(0)
    kp, k1, k2, k3, k4, k5, k6 = jax.random.split(key, 7)

    params = init_params(kp, dims)
    graph = build_graph(B, n_nodes, act_dims)
    packed = pack_model(params, graph, dims)
    N = B * n_nodes

    node_feat = jax.random.normal(k1, (N, dim_in_node), jnp.float32)
    g_repr = jax.random.normal(k2, (B, dim_in_u), jnp.float32)
    hidden_n = (0.1 * jax.random.normal(k3, (1, N, dim_lstm_out), jnp.float32),
                0.1 * jax.random.normal(k4, (1, N, dim_lstm_out), jnp.float32))
    hidden_n_u = (0.1 * jax.random.normal(k5, (1, N, dim_lstm_out), jnp.float32),
                  0.1 * jax.random.normal(k6, (1, N, dim_lstm_out), jnp.float32))

    fwd = jax.jit(lambda nf, gr, hn, hnu:
                  lstm_mrf_forward(packed, nf, gr, hn, hnu))
    out, act_logits, model_hid, n_hid_u = fwd(node_feat, g_repr, hidden_n, hidden_n_u)
    jax.block_until_ready((out, act_logits, model_hid, n_hid_u))

    # Check against a pure-JAX reference of the same forward semantics.
    r_out, r_logits, r_hid, r_hid_u = reference_forward(
        params, graph, node_feat, g_repr, hidden_n, hidden_n_u)
    tol = dict(rtol=2e-2, atol=2e-3)
    np.testing.assert_allclose(np.asarray(out), np.asarray(r_out), **tol)
    np.testing.assert_allclose(np.asarray(act_logits), np.asarray(r_logits), **tol)
    np.testing.assert_allclose(np.asarray(model_hid[0]), np.asarray(r_hid[0]), **tol)
    np.testing.assert_allclose(np.asarray(model_hid[1]), np.asarray(r_hid[1]), **tol)
    np.testing.assert_allclose(np.asarray(n_hid_u[0]), np.asarray(r_hid_u[0]), **tol)
    np.testing.assert_allclose(np.asarray(n_hid_u[1]), np.asarray(r_hid_u[1]), **tol)

    assert out.shape == (B, act_dims)
    assert act_logits.shape == (N, act_dims)
    print("KERNEL_OK")
</pallas_src>

<mosaic_0001>
module attributes {stable_mosaic.version = 11 : i64} {
  func.func @kernel(%arg0: memref<16x128xf32, #tpu.memory_space<vmem>>, %arg1: memref<168x128xf32, #tpu.memory_space<vmem>>, %arg2: memref<648x128xf32, #tpu.memory_space<vmem>>, %arg3: memref<8x128xf32, #tpu.memory_space<vmem>>, %arg4: memref<8x128xf32, #tpu.memory_space<vmem>>) attributes {dimension_semantics = [], scalar_prefetch = 0 : i64, scratch_operands = 0 : i64, tpu.core_type = #tpu.core_type<tc>} {
    %c0 = arith.constant 0 : index
    %c0_0 = arith.constant 0 : index
    %0 = vector.load %arg0[%c0, %c0_0] : memref<16x128xf32, #tpu.memory_space<vmem>>, vector<8x128xf32>
    %1 = vector.extract_strided_slice %0 {offsets = [0, 0], sizes = [8, 10], strides = [1, 1]} : vector<8x128xf32> to vector<8x10xf32>
    %2 = vector.extract_strided_slice %0 {offsets = [0, 10], sizes = [8, 32], strides = [1, 1]} : vector<8x128xf32> to vector<8x32xf32>
    %3 = vector.extract_strided_slice %0 {offsets = [0, 42], sizes = [8, 32], strides = [1, 1]} : vector<8x128xf32> to vector<8x32xf32>
    %c8 = arith.constant 8 : index
    %c0_1 = arith.constant 0 : index
    %4 = vector.load %arg0[%c8, %c0_1] : memref<16x128xf32, #tpu.memory_space<vmem>>, vector<8x5xf32>
    %c0_2 = arith.constant 0 : index
    %c0_3 = arith.constant 0 : index
    %5 = vector.load %arg1[%c0_2, %c0_3] : memref<168x128xf32, #tpu.memory_space<vmem>>, vector<24x8xf32>
    %c24 = arith.constant 24 : index
    %c0_4 = arith.constant 0 : index
    %6 = vector.load %arg1[%c24, %c0_4] : memref<168x128xf32, #tpu.memory_space<vmem>>, vector<32x8xf32>
    %c56 = arith.constant 56 : index
    %c0_5 = arith.constant 0 : index
    %7 = vector.load %arg1[%c56, %c0_5] : memref<168x128xf32, #tpu.memory_space<vmem>>, vector<8x16xf32>
    %c64 = arith.constant 64 : index
    %c0_6 = arith.constant 0 : index
    %8 = vector.load %arg1[%c64, %c0_6] : memref<168x128xf32, #tpu.memory_space<vmem>>, vector<8x8xf32>
    %9 = vector.extract_strided_slice %5 {offsets = [0, 0], sizes = [8, 8], strides = [1, 1]} : vector<24x8xf32> to vector<8x8xf32>
    %cst = arith.constant dense<0.000000e+00> : vector<8x5xf32>
    %10 = tpu.matmul %9, %4, %cst {dimension_numbers = #tpu.dot_dimension_numbers<[1], [0], [0], [1], [0, 0, 1, 1], [], []>} : vector<8x8xf32>, vector<8x5xf32>, vector<8x5xf32> -> vector<8x5xf32>
    %c0_7 = arith.constant 0 : index
    %c0_8 = arith.constant 0 : index
    %11 = vector.load %arg2[%c0_7, %c0_8] : memref<648x128xf32, #tpu.memory_space<vmem>>, vector<10x64xf32>
    %cst_9 = arith.constant dense<0.000000e+00> : vector<8x64xf32>
    %12 = tpu.matmul %1, %11, %cst_9 {dimension_numbers = #tpu.dot_dimension_numbers<[1], [0], [0], [1], [0, 0, 1, 1], [], []>} : vector<8x10xf32>, vector<10x64xf32>, vector<8x64xf32> -> vector<8x64xf32>
    %c16 = arith.constant 16 : index
    %c0_10 = arith.constant 0 : index
    %13 = vector.load %arg2[%c16, %c0_10] : memref<648x128xf32, #tpu.memory_space<vmem>>, vector<5x64xf32>
    %cst_11 = arith.constant dense<0.000000e+00> : vector<8x64xf32>
    %14 = tpu.matmul %10, %13, %cst_11 {dimension_numbers = #tpu.dot_dimension_numbers<[1], [0], [0], [1], [0, 0, 1, 1], [], []>} : vector<8x5xf32>, vector<5x64xf32>, vector<8x64xf32> -> vector<8x64xf32>
    %15 = arith.addf %12, %14 : vector<8x64xf32>
    %c24_12 = arith.constant 24 : index
    %c0_13 = arith.constant 0 : index
    %16 = vector.load %arg2[%c24_12, %c0_13] : memref<648x128xf32, #tpu.memory_space<vmem>>, vector<1x64xf32>
    %17 = vector.broadcast %16 : vector<1x64xf32> to vector<8x64xf32>
    %18 = arith.addf %15, %17 : vector<8x64xf32>
    %cst_14 = arith.constant 0.000000e+00 : f32
    %19 = vector.broadcast %cst_14 : f32 to vector<8x64xf32>
    %20 = arith.maximumf %18, %19 : vector<8x64xf32>
    %c32 = arith.constant 32 : index
    %c0_15 = arith.constant 0 : index
    %21 = vector.load %arg2[%c32, %c0_15] : memref<648x128xf32, #tpu.memory_space<vmem>>, vector<64x32xf32>
    %cst_16 = arith.constant dense<0.000000e+00> : vector<8x32xf32>
    %22 = tpu.matmul %20, %21, %cst_16 {dimension_numbers = #tpu.dot_dimension_numbers<[1], [0], [0], [1], [0, 0, 1, 1], [], []>} : vector<8x64xf32>, vector<64x32xf32>, vector<8x32xf32> -> vector<8x32xf32>
    %c96 = arith.constant 96 : index
    %c0_17 = arith.constant 0 : index
    %23 = vector.load %arg2[%c96, %c0_17] : memref<648x128xf32, #tpu.memory_space<vmem>>, vector<1x32xf32>
    %24 = vector.broadcast %23 : vector<1x32xf32> to vector<8x32xf32>
    %25 = arith.addf %22, %24 : vector<8x32xf32>
    %c104 = arith.constant 104 : index
    %c0_18 = arith.constant 0 : index
    %26 = vector.load %arg2[%c104, %c0_18] : memref<648x128xf32, #tpu.memory_space<vmem>>, vector<32x128xf32>
    %cst_19 = arith.constant dense<0.000000e+00> : vector<8x128xf32>
    %27 = tpu.matmul %25, %26, %cst_19 {dimension_numbers = #tpu.dot_dimension_numbers<[1], [0], [0], [1], [0, 0, 1, 1], [], []>} : vector<8x32xf32>, vector<32x128xf32>, vector<8x128xf32> -> vector<8x128xf32>
    %c136 = arith.constant 136 : index
    %c0_20 = arith.constant 0 : index
    %28 = vector.load %arg2[%c136, %c0_20] : memref<648x128xf32, #tpu.memory_space<vmem>>, vector<32x128xf32>
    %cst_21 = arith.constant dense<0.000000e+00> : vector<8x128xf32>
    %29 = tpu.matmul %2, %28, %cst_21 {dimension_numbers = #tpu.dot_dimension_numbers<[1], [0], [0], [1], [0, 0, 1, 1], [], []>} : vector<8x32xf32>, vector<32x128xf32>, vector<8x128xf32> -> vector<8x128xf32>
    %30 = arith.addf %27, %29 : vector<8x128xf32>
    %c168 = arith.constant 168 : index
    %c0_22 = arith.constant 0 : index
    %31 = vector.load %arg2[%c168, %c0_22] : memref<648x128xf32, #tpu.memory_space<vmem>>, vector<1x128xf32>
    %32 = vector.broadcast %31 : vector<1x128xf32> to vector<8x128xf32>
    %33 = arith.addf %30, %32 : vector<8x128xf32>
    %34 = vector.extract_strided_slice %33 {offsets = [0, 0], sizes = [8, 32], strides = [1, 1]} : vector<8x128xf32> to vector<8x32xf32>
    %35 = arith.negf %34 : vector<8x32xf32>
    %36 = math.exp %35 : vector<8x32xf32>
    %cst_23 = arith.constant 1.000000e+00 : f32
    %37 = vector.broadcast %cst_23 : f32 to vector<8x32xf32>
    %38 = arith.addf %37, %36 : vector<8x32xf32>
    %39 = arith.divf %37, %38 : vector<8x32xf32>
    %40 = vector.extract_strided_slice %33 {offsets = [0, 32], sizes = [8, 32], strides = [1, 1]} : vector<8x128xf32> to vector<8x32xf32>
    %41 = arith.negf %40 : vector<8x32xf32>
    %42 = math.exp %41 : vector<8x32xf32>
    %cst_24 = arith.constant 1.000000e+00 : f32
    %43 = vector.broadcast %cst_24 : f32 to vector<8x32xf32>
    %44 = arith.addf %43, %42 : vector<8x32xf32>
    %45 = arith.divf %43, %44 : vector<8x32xf32>
    %46 = vector.extract_strided_slice %33 {offsets = [0, 64], sizes = [8, 32], strides = [1, 1]} : vector<8x128xf32> to vector<8x32xf32>
    %47 = math.tanh %46 : vector<8x32xf32>
    %48 = vector.extract_strided_slice %33 {offsets = [0, 96], sizes = [8, 32], strides = [1, 1]} : vector<8x128xf32> to vector<8x32xf32>
    %49 = arith.negf %48 : vector<8x32xf32>
    %50 = math.exp %49 : vector<8x32xf32>
    %cst_25 = arith.constant 1.000000e+00 : f32
    %51 = vector.broadcast %cst_25 : f32 to vector<8x32xf32>
    %52 = arith.addf %51, %50 : vector<8x32xf32>
    %53 = arith.divf %51, %52 : vector<8x32xf32>
    %54 = arith.mulf %45, %3 : vector<8x32xf32>
    %55 = arith.mulf %39, %47 : vector<8x32xf32>
    %56 = arith.addf %54, %55 : vector<8x32xf32>
    %57 = math.tanh %56 : vector<8x32xf32>
    %58 = arith.mulf %53, %57 : vector<8x32xf32>
    %cst_26 = arith.constant 0.000000e+00 : f32
    %59 = vector.broadcast %cst_26 : f32 to vector<8x32xf32>
    %60 = arith.maximumf %58, %59 : vector<8x32xf32>
    %c176 = arith.constant 176 : index
    %c0_27 = arith.constant 0 : index
    %61 = vector.load %arg2[%c176, %c0_27] : memref<648x128xf32, #tpu.memory_space<vmem>>, vector<32x24xf32>
    %cst_28 = arith.constant dense<0.000000e+00> : vector<8x24xf32>
    %62 = tpu.matmul %60, %61, %cst_28 {dimension_numbers = #tpu.dot_dimension_numbers<[1], [0], [0], [1], [0, 0, 1, 1], [], []>} : vector<8x32xf32>, vector<32x24xf32>, vector<8x24xf32> -> vector<8x24xf32>
    %c208 = arith.constant 208 : index
    %c0_29 = arith.constant 0 : index
    %63 = vector.load %arg2[%c208, %c0_29] : memref<648x128xf32, #tpu.memory_space<vmem>>, vector<1x24xf32>
    %64 = vector.broadcast %63 : vector<1x24xf32> to vector<8x24xf32>
    %65 = arith.addf %62, %64 : vector<8x24xf32>
    %66 = vector.extract_strided_slice %65 {offsets = [0, 0], sizes = [8, 12], strides = [1, 1]} : vector<8x24xf32> to vector<8x12xf32>
    %cst_30 = arith.constant dense<0.000000e+00> : vector<8x12xf32>
    %67 = tpu.matmul %8, %66, %cst_30 {dimension_numbers = #tpu.dot_dimension_numbers<[1], [0], [0], [1], [0, 0, 1, 1], [], []>} : vector<8x8xf32>, vector<8x12xf32>, vector<8x12xf32> -> vector<8x12xf32>
    %cst_31 = arith.constant dense<0.000000e+00> : vector<24x12xf32>
    %68 = tpu.matmul %5, %67, %cst_31 {dimension_numbers = #tpu.dot_dimension_numbers<[1], [0], [0], [1], [0, 0, 1, 1], [], []>} : vector<24x8xf32>, vector<8x12xf32>, vector<24x12xf32> -> vector<24x12xf32>
    %69 = vector.extract_strided_slice %68 {offsets = [0, 0], sizes = [8, 12], strides = [1, 1]} : vector<24x12xf32> to vector<8x12xf32>
    %70 = vector.extract_strided_slice %68 {offsets = [8, 0], sizes = [16, 12], strides = [1, 1]} : vector<24x12xf32> to vector<16x12xf32>
    %cst_32 = arith.constant dense<0.000000e+00> : vector<32x24xf32>
    %71 = tpu.matmul %6, %65, %cst_32 {dimension_numbers = #tpu.dot_dimension_numbers<[1], [0], [0], [1], [0, 0, 1, 1], [], []>} : vector<32x8xf32>, vector<8x24xf32>, vector<32x24xf32> -> vector<32x24xf32>
    %72 = vector.extract_strided_slice %71 {offsets = [0, 12], sizes = [16, 12], strides = [1, 1]} : vector<32x24xf32> to vector<16x12xf32>
    %73 = vector.extract_strided_slice %71 {offsets = [16, 12], sizes = [16, 12], strides = [1, 1]} : vector<32x24xf32> to vector<16x12xf32>
    %c216 = arith.constant 216 : index
    %c0_33 = arith.constant 0 : index
    %74 = vector.load %arg2[%c216, %c0_33] : memref<648x128xf32, #tpu.memory_space<vmem>>, vector<12x32xf32>
    %cst_34 = arith.constant dense<0.000000e+00> : vector<16x32xf32>
    %75 = tpu.matmul %72, %74, %cst_34 {dimension_numbers = #tpu.dot_dimension_numbers<[1], [0], [0], [1], [0, 0, 1, 1], [], []>} : vector<16x12xf32>, vector<12x32xf32>, vector<16x32xf32> -> vector<16x32xf32>
    %c232 = arith.constant 232 : index
    %c0_35 = arith.constant 0 : index
    %76 = vector.load %arg2[%c232, %c0_35] : memref<648x128xf32, #tpu.memory_space<vmem>>, vector<12x32xf32>
    %cst_36 = arith.constant dense<0.000000e+00> : vector<16x32xf32>
    %77 = tpu.matmul %73, %76, %cst_36 {dimension_numbers = #tpu.dot_dimension_numbers<[1], [0], [0], [1], [0, 0, 1, 1], [], []>} : vector<16x12xf32>, vector<12x32xf32>, vector<16x32xf32> -> vector<16x32xf32>
    %78 = arith.addf %75, %77 : vector<16x32xf32>
    %c248 = arith.constant 248 : index
    %c0_37 = arith.constant 0 : index
    %79 = vector.load %arg2[%c248, %c0_37] : memref<648x128xf32, #tpu.memory_space<vmem>>, vector<1x32xf32>
    %80 = vector.broadcast %79 : vector<1x32xf32> to vector<16x32xf32>
    %81 = arith.addf %78, %80 : vector<16x32xf32>
    %cst_38 = arith.constant 0.000000e+00 : f32
    %82 = vector.broadcast %cst_38 : f32 to vector<16x32xf32>
    %83 = arith.maximumf %81, %82 : vector<16x32xf32>
    %c256 = arith.constant 256 : index
    %c0_39 = arith.constant 0 : index
    %84 = vector.load %arg2[%c256, %c0_39] : memref<648x128xf32, #tpu.memory_space<vmem>>, vector<32x8xf32>
    %cst_40 = arith.constant dense<0.000000e+00> : vector<16x8xf32>
    %85 = tpu.matmul %83, %84, %cst_40 {dimension_numbers = #tpu.dot_dimension_numbers<[1], [0], [0], [1], [0, 0, 1, 1], [], []>} : vector<16x32xf32>, vector<32x8xf32>, vector<16x8xf32> -> vector<16x8xf32>
    %c288 = arith.constant 288 : index
    %c0_41 = arith.constant 0 : index
    %86 = vector.load %arg2[%c288, %c0_41] : memref<648x128xf32, #tpu.memory_space<vmem>>, vector<1x8xf32>
    %87 = vector.broadcast %86 : vector<1x8xf32> to vector<16x8xf32>
    %88 = arith.addf %85, %87 : vector<16x8xf32>
    %cst_42 = arith.constant dense<0.000000e+00> : vector<8x8xf32>
    %89 = tpu.matmul %7, %88, %cst_42 {dimension_numbers = #tpu.dot_dimension_numbers<[1], [0], [0], [1], [0, 0, 1, 1], [], []>} : vector<8x16xf32>, vector<16x8xf32>, vector<8x8xf32> -> vector<8x8xf32>
    %90 = vector.extract_strided_slice %65 {offsets = [0, 12], sizes = [8, 12], strides = [1, 1]} : vector<8x24xf32> to vector<8x12xf32>
    %c296 = arith.constant 296 : index
    %c0_43 = arith.constant 0 : index
    %91 = vector.load %arg2[%c296, %c0_43] : memref<648x128xf32, #tpu.memory_space<vmem>>, vector<12x32xf32>
    %cst_44 = arith.constant dense<0.000000e+00> : vector<8x32xf32>
    %92 = tpu.matmul %90, %91, %cst_44 {dimension_numbers = #tpu.dot_dimension_numbers<[1], [0], [0], [1], [0, 0, 1, 1], [], []>} : vector<8x12xf32>, vector<12x32xf32>, vector<8x32xf32> -> vector<8x32xf32>
    %c312 = arith.constant 312 : index
    %c0_45 = arith.constant 0 : index
    %93 = vector.load %arg2[%c312, %c0_45] : memref<648x128xf32, #tpu.memory_space<vmem>>, vector<8x32xf32>
    %cst_46 = arith.constant dense<0.000000e+00> : vector<8x32xf32>
    %94 = tpu.matmul %89, %93, %cst_46 {dimension_numbers = #tpu.dot_dimension_numbers<[1], [0], [0], [1], [0, 0, 1, 1], [], []>} : vector<8x8xf32>, vector<8x32xf32>, vector<8x32xf32> -> vector<8x32xf32>
    %95 = arith.addf %92, %94 : vector<8x32xf32>
    %c320 = arith.constant 320 : index
    %c0_47 = arith.constant 0 : index
    %96 = vector.load %arg2[%c320, %c0_47] : memref<648x128xf32, #tpu.memory_space<vmem>>, vector<1x32xf32>
    %97 = vector.broadcast %96 : vector<1x32xf32> to vector<8x32xf32>
    %98 = arith.addf %95, %97 : vector<8x32xf32>
    %cst_48 = arith.constant 0.000000e+00 : f32
    %99 = vector.broadcast %cst_48 : f32 to vector<8x32xf32>
    %100 = arith.maximumf %98, %99 : vector<8x32xf32>
    %c328 = arith.constant 328 : index
    %c0_49 = arith.constant 0 : index
    %101 = vector.load %arg2[%c328, %c0_49] : memref<648x128xf32, #tpu.memory_space<vmem>>, vector<32x8xf32>
    %cst_50 = arith.constant dense<0.000000e+00> : vector<8x8xf32>
    %102 = tpu.matmul %100, %101, %cst_50 {dimension_numbers = #tpu.dot_dimension_numbers<[1], [0], [0], [1], [0, 0, 1, 1], [], []>} : vector<8x32xf32>, vector<32x8xf32>, vector<8x8xf32> -> vector<8x8xf32>
    %c360 = arith.constant 360 : index
    %c0_51 = arith.constant 0 : index
    %103 = vector.load %arg2[%c360, %c0_51] : memref<648x128xf32, #tpu.memory_space<vmem>>, vector<1x8xf32>
    %104 = vector.broadcast %103 : vector<1x8xf32> to vector<8x8xf32>
    %105 = arith.addf %102, %104 : vector<8x8xf32>
    %c368 = arith.constant 368 : index
    %c0_52 = arith.constant 0 : index
    %106 = vector.load %arg2[%c368, %c0_52] : memref<648x128xf32, #tpu.memory_space<vmem>>, vector<8x16xf32>
    %cst_53 = arith.constant dense<0.000000e+00> : vector<8x16xf32>
    %107 = tpu.matmul %105, %106, %cst_53 {dimension_numbers = #tpu.dot_dimension_numbers<[1], [0], [0], [1], [0, 0, 1, 1], [], []>} : vector<8x8xf32>, vector<8x16xf32>, vector<8x16xf32> -> vector<8x16xf32>
    %c376 = arith.constant 376 : index
    %c0_54 = arith.constant 0 : index
    %108 = vector.load %arg2[%c376, %c0_54] : memref<648x128xf32, #tpu.memory_space<vmem>>, vector<1x16xf32>
    %109 = vector.broadcast %108 : vector<1x16xf32> to vector<8x16xf32>
    %110 = arith.addf %107, %109 : vector<8x16xf32>
    %cst_55 = arith.constant 0.000000e+00 : f32
    %111 = vector.broadcast %cst_55 : f32 to vector<8x16xf32>
    %112 = arith.maximumf %110, %111 : vector<8x16xf32>
    %c384 = arith.constant 384 : index
    %c0_56 = arith.constant 0 : index
    %113 = vector.load %arg2[%c384, %c0_56] : memref<648x128xf32, #tpu.memory_space<vmem>>, vector<16x5xf32>
    %cst_57 = arith.constant dense<0.000000e+00> : vector<8x5xf32>
    %114 = tpu.matmul %112, %113, %cst_57 {dimension_numbers = #tpu.dot_dimension_numbers<[1], [0], [0], [1], [0, 0, 1, 1], [], []>} : vector<8x16xf32>, vector<16x5xf32>, vector<8x5xf32> -> vector<8x5xf32>
    %c400 = arith.constant 400 : index
    %c0_58 = arith.constant 0 : index
    %115 = vector.load %arg2[%c400, %c0_58] : memref<648x128xf32, #tpu.memory_space<vmem>>, vector<1x5xf32>
    %116 = vector.broadcast %115 : vector<1x5xf32> to vector<8x5xf32>
    %117 = arith.addf %114, %116 : vector<8x5xf32>
    %cst_59 = arith.constant dense<0xFF800000> : vector<8xf32>
    %118 = vector.multi_reduction <maximumf>, %117, %cst_59 [1] : vector<8x5xf32> to vector<8xf32>
    %119 = vector.shape_cast %118 : vector<8xf32> to vector<8x1xf32>
    %120 = vector.broadcast %119 : vector<8x1xf32> to vector<8x5xf32>
    %121 = arith.subf %117, %120 : vector<8x5xf32>
    %122 = math.exp %121 : vector<8x5xf32>
    %cst_60 = arith.constant dense<0.000000e+00> : vector<8xf32>
    %123 = vector.multi_reduction <add>, %122, %cst_60 [1] : vector<8x5xf32> to vector<8xf32>
    %124 = vector.shape_cast %123 : vector<8xf32> to vector<8x1xf32>
    %125 = tpu.reciprocal %124 {approx = true} : vector<8x1xf32> -> vector<8x1xf32>
    %126 = vector.broadcast %125 : vector<8x1xf32> to vector<8x5xf32>
    %127 = arith.mulf %122, %126 : vector<8x5xf32>
    %128 = vector.extract_strided_slice %65 {offsets = [0, 0], sizes = [8, 12], strides = [1, 1]} : vector<8x24xf32> to vector<8x12xf32>
    %c408 = arith.constant 408 : index
    %c0_61 = arith.constant 0 : index
    %129 = vector.load %arg2[%c408, %c0_61] : memref<648x128xf32, #tpu.memory_space<vmem>>, vector<12x32xf32>
    %cst_62 = arith.constant dense<0.000000e+00> : vector<8x32xf32>
    %130 = tpu.matmul %128, %129, %cst_62 {dimension_numbers = #tpu.dot_dimension_numbers<[1], [0], [0], [1], [0, 0, 1, 1], [], []>} : vector<8x12xf32>, vector<12x32xf32>, vector<8x32xf32> -> vector<8x32xf32>
    %c424 = arith.constant 424 : index
    %c0_63 = arith.constant 0 : index
    %131 = vector.load %arg2[%c424, %c0_63] : memref<648x128xf32, #tpu.memory_space<vmem>>, vector<12x32xf32>
    %cst_64 = arith.constant dense<0.000000e+00> : vector<8x32xf32>
    %132 = tpu.matmul %69, %131, %cst_64 {dimension_numbers = #tpu.dot_dimension_numbers<[1], [0], [0], [1], [0, 0, 1, 1], [], []>} : vector<8x12xf32>, vector<12x32xf32>, vector<8x32xf32> -> vector<8x32xf32>
    %133 = arith.addf %130, %132 : vector<8x32xf32>
    %c440 = arith.constant 440 : index
    %c0_65 = arith.constant 0 : index
    %134 = vector.load %arg2[%c440, %c0_65] : memref<648x128xf32, #tpu.memory_space<vmem>>, vector<1x32xf32>
    %135 = vector.broadcast %134 : vector<1x32xf32> to vector<8x32xf32>
    %136 = arith.addf %133, %135 : vector<8x32xf32>
    %cst_66 = arith.constant 0.000000e+00 : f32
    %137 = vector.broadcast %cst_66 : f32 to vector<8x32xf32>
    %138 = arith.maximumf %136, %137 : vector<8x32xf32>
    %c448 = arith.constant 448 : index
    %c0_67 = arith.constant 0 : index
    %139 = vector.load %arg2[%c448, %c0_67] : memref<648x128xf32, #tpu.memory_space<vmem>>, vector<32x32xf32>
    %cst_68 = arith.constant dense<0.000000e+00> : vector<8x32xf32>
    %140 = tpu.matmul %138, %139, %cst_68 {dimension_numbers = #tpu.dot_dimension_numbers<[1], [0], [0], [1], [0, 0, 1, 1], [], []>} : vector<8x32xf32>, vector<32x32xf32>, vector<8x32xf32> -> vector<8x32xf32>
    %c480 = arith.constant 480 : index
    %c0_69 = arith.constant 0 : index
    %141 = vector.load %arg2[%c480, %c0_69] : memref<648x128xf32, #tpu.memory_space<vmem>>, vector<1x32xf32>
    %142 = vector.broadcast %141 : vector<1x32xf32> to vector<8x32xf32>
    %143 = arith.addf %140, %142 : vector<8x32xf32>
    %cst_70 = arith.constant 0.000000e+00 : f32
    %144 = vector.broadcast %cst_70 : f32 to vector<8x32xf32>
    %145 = arith.maximumf %143, %144 : vector<8x32xf32>
    %c488 = arith.constant 488 : index
    %c0_71 = arith.constant 0 : index
    %146 = vector.load %arg2[%c488, %c0_71] : memref<648x128xf32, #tpu.memory_space<vmem>>, vector<32x5xf32>
    %cst_72 = arith.constant dense<0.000000e+00> : vector<8x5xf32>
    %147 = tpu.matmul %145, %146, %cst_72 {dimension_numbers = #tpu.dot_dimension_numbers<[1], [0], [0], [1], [0, 0, 1, 1], [], []>} : vector<8x32xf32>, vector<32x5xf32>, vector<8x5xf32> -> vector<8x5xf32>
    %c520 = arith.constant 520 : index
    %c0_73 = arith.constant 0 : index
    %148 = vector.load %arg2[%c520, %c0_73] : memref<648x128xf32, #tpu.memory_space<vmem>>, vector<1x5xf32>
    %149 = vector.broadcast %148 : vector<1x5xf32> to vector<8x5xf32>
    %150 = arith.addf %147, %149 : vector<8x5xf32>
    %151 = vector.extract_strided_slice %71 {offsets = [0, 0], sizes = [32, 12], strides = [1, 1]} : vector<32x24xf32> to vector<32x12xf32>
    %c528 = arith.constant 528 : index
    %c0_74 = arith.constant 0 : index
    %152 = vector.load %arg2[%c528, %c0_74] : memref<648x128xf32, #tpu.memory_space<vmem>>, vector<12x64xf32>
    %cst_75 = arith.constant dense<0.000000e+00> : vector<32x64xf32>
    %153 = tpu.matmul %151, %152, %cst_75 {dimension_numbers = #tpu.dot_dimension_numbers<[1], [0], [0], [1], [0, 0, 1, 1], [], []>} : vector<32x12xf32>, vector<12x64xf32>, vector<32x64xf32> -> vector<32x64xf32>
    %154 = vector.extract_strided_slice %153 {offsets = [0, 0], sizes = [16, 32], strides = [1, 1]} : vector<32x64xf32> to vector<16x32xf32>
    %155 = vector.extract_strided_slice %153 {offsets = [0, 32], sizes = [16, 32], strides = [1, 1]} : vector<32x64xf32> to vector<16x32xf32>
    %156 = vector.extract_strided_slice %153 {offsets = [16, 0], sizes = [16, 32], strides = [1, 1]} : vector<32x64xf32> to vector<16x32xf32>
    %157 = vector.extract_strided_slice %153 {offsets = [16, 32], sizes = [16, 32], strides = [1, 1]} : vector<32x64xf32> to vector<16x32xf32>
    %c544 = arith.constant 544 : index
    %c0_76 = arith.constant 0 : index
    %158 = vector.load %arg2[%c544, %c0_76] : memref<648x128xf32, #tpu.memory_space<vmem>>, vector<12x32xf32>
    %cst_77 = arith.constant dense<0.000000e+00> : vector<16x32xf32>
    %159 = tpu.matmul %70, %158, %cst_77 {dimension_numbers = #tpu.dot_dimension_numbers<[1], [0], [0], [1], [0, 0, 1, 1], [], []>} : vector<16x12xf32>, vector<12x32xf32>, vector<16x32xf32> -> vector<16x32xf32>
    %c560 = arith.constant 560 : index
    %c0_78 = arith.constant 0 : index
    %160 = vector.load %arg2[%c560, %c0_78] : memref<648x128xf32, #tpu.memory_space<vmem>>, vector<1x32xf32>
    %161 = vector.broadcast %160 : vector<1x32xf32> to vector<16x32xf32>
    %162 = arith.addf %159, %161 : vector<16x32xf32>
    %163 = arith.addf %154, %157 : vector<16x32xf32>
    %164 = arith.addf %163, %162 : vector<16x32xf32>
    %165 = arith.addf %156, %155 : vector<16x32xf32>
    %166 = arith.addf %165, %162 : vector<16x32xf32>
    %167 = tpu.concatenate %164, %166 in 0 : vector<16x32xf32>, vector<16x32xf32> -> vector<32x32xf32>
    %cst_79 = arith.constant 0.000000e+00 : f32
    %168 = vector.broadcast %cst_79 : f32 to vector<32x32xf32>
    %169 = arith.maximumf %167, %168 : vector<32x32xf32>
    %c568 = arith.constant 568 : index
    %c0_80 = arith.constant 0 : index
    %170 = vector.load %arg2[%c568, %c0_80] : memref<648x128xf32, #tpu.memory_space<vmem>>, vector<32x32xf32>
    %cst_81 = arith.constant dense<0.000000e+00> : vector<32x32xf32>
    %171 = tpu.matmul %169, %170, %cst_81 {dimension_numbers = #tpu.dot_dimension_numbers<[1], [0], [0], [1], [0, 0, 1, 1], [], []>} : vector<32x32xf32>, vector<32x32xf32>, vector<32x32xf32> -> vector<32x32xf32>
    %c600 = arith.constant 600 : index
    %c0_82 = arith.constant 0 : index
    %172 = vector.load %arg2[%c600, %c0_82] : memref<648x128xf32, #tpu.memory_space<vmem>>, vector<1x32xf32>
    %173 = vector.broadcast %172 : vector<1x32xf32> to vector<32x32xf32>
    %174 = arith.addf %171, %173 : vector<32x32xf32>
    %cst_83 = arith.constant 0.000000e+00 : f32
    %175 = vector.broadcast %cst_83 : f32 to vector<32x32xf32>
    %176 = arith.maximumf %174, %175 : vector<32x32xf32>
    %c608 = arith.constant 608 : index
    %c0_84 = arith.constant 0 : index
    %177 = vector.load %arg2[%c608, %c0_84] : memref<648x128xf32, #tpu.memory_space<vmem>>, vector<32x25xf32>
    %cst_85 = arith.constant dense<0.000000e+00> : vector<32x25xf32>
    %178 = tpu.matmul %176, %177, %cst_85 {dimension_numbers = #tpu.dot_dimension_numbers<[1], [0], [0], [1], [0, 0, 1, 1], [], []>} : vector<32x32xf32>, vector<32x25xf32>, vector<32x25xf32> -> vector<32x25xf32>
    %c640 = arith.constant 640 : index
    %c0_86 = arith.constant 0 : index
    %179 = vector.load %arg2[%c640, %c0_86] : memref<648x128xf32, #tpu.memory_space<vmem>>, vector<1x25xf32>
    %180 = vector.broadcast %179 : vector<1x25xf32> to vector<32x25xf32>
    %181 = arith.addf %178, %180 : vector<32x25xf32>
    %182 = vector.extract_strided_slice %181 {offsets = [0, 0], sizes = [16, 25], strides = [1, 1]} : vector<32x25xf32> to vector<16x25xf32>
    %183 = vector.extract_strided_slice %181 {offsets = [16, 0], sizes = [16, 25], strides = [1, 1]} : vector<32x25xf32> to vector<16x25xf32>
    %cst_87 = arith.constant dense<0.000000e+00> : vector<32x5xf32>
    %184 = tpu.matmul %6, %127, %cst_87 {dimension_numbers = #tpu.dot_dimension_numbers<[1], [0], [0], [1], [0, 0, 1, 1], [], []>} : vector<32x8xf32>, vector<8x5xf32>, vector<32x5xf32> -> vector<32x5xf32>
    %185 = vector.extract_strided_slice %184 {offsets = [0, 0], sizes = [16, 5], strides = [1, 1]} : vector<32x5xf32> to vector<16x5xf32>
    %186 = vector.extract_strided_slice %184 {offsets = [16, 0], sizes = [16, 5], strides = [1, 1]} : vector<32x5xf32> to vector<16x5xf32>
    %c160 = arith.constant 160 : index
    %c0_88 = arith.constant 0 : index
    %187 = vector.load %arg1[%c160, %c0_88] : memref<168x128xf32, #tpu.memory_space<vmem>>, vector<5x25xf32>
    %cst_89 = arith.constant dense<0.000000e+00> : vector<16x25xf32>
    %188 = tpu.matmul %185, %187, %cst_89 {dimension_numbers = #tpu.dot_dimension_numbers<[1], [0], [0], [1], [0, 0, 1, 1], [], []>} : vector<16x5xf32>, vector<5x25xf32>, vector<16x25xf32> -> vector<16x25xf32>
    %c152 = arith.constant 152 : index
    %c0_90 = arith.constant 0 : index
    %189 = vector.load %arg1[%c152, %c0_90] : memref<168x128xf32, #tpu.memory_space<vmem>>, vector<5x25xf32>
    %cst_91 = arith.constant dense<0.000000e+00> : vector<16x25xf32>
    %190 = tpu.matmul %185, %189, %cst_91 {dimension_numbers = #tpu.dot_dimension_numbers<[1], [0], [0], [1], [0, 0, 1, 1], [], []>} : vector<16x5xf32>, vector<5x25xf32>, vector<16x25xf32> -> vector<16x25xf32>
    %191 = arith.mulf %182, %188 : vector<16x25xf32>
    %c88 = arith.constant 88 : index
    %c0_92 = arith.constant 0 : index
    %192 = vector.load %arg1[%c88, %c0_92] : memref<168x128xf32, #tpu.memory_space<vmem>>, vector<25x5xf32>
    %cst_93 = arith.constant dense<0.000000e+00> : vector<16x5xf32>
    %193 = tpu.matmul %191, %192, %cst_93 {dimension_numbers = #tpu.dot_dimension_numbers<[1], [0], [0], [1], [0, 0, 1, 1], [], []>} : vector<16x25xf32>, vector<25x5xf32>, vector<16x5xf32> -> vector<16x5xf32>
    %194 = arith.mulf %183, %190 : vector<16x25xf32>
    %c120 = arith.constant 120 : index
    %c0_94 = arith.constant 0 : index
    %195 = vector.load %arg1[%c120, %c0_94] : memref<168x128xf32, #tpu.memory_space<vmem>>, vector<25x5xf32>
    %cst_95 = arith.constant dense<0.000000e+00> : vector<16x5xf32>
    %196 = tpu.matmul %194, %195, %cst_95 {dimension_numbers = #tpu.dot_dimension_numbers<[1], [0], [0], [1], [0, 0, 1, 1], [], []>} : vector<16x25xf32>, vector<25x5xf32>, vector<16x5xf32> -> vector<16x5xf32>
    %197 = arith.addf %193, %196 : vector<16x5xf32>
    %cst_96 = arith.constant 5.000000e-01 : f32
    %198 = vector.broadcast %cst_96 : f32 to vector<16x5xf32>
    %199 = arith.mulf %198, %197 : vector<16x5xf32>
    %200 = arith.mulf %199, %186 : vector<16x5xf32>
    %cst_97 = arith.constant dense<0.000000e+00> : vector<16xf32>
    %201 = vector.multi_reduction <add>, %200, %cst_97 [1] : vector<16x5xf32> to vector<16xf32>
    %202 = vector.shape_cast %201 : vector<16xf32> to vector<16x1xf32>
    %cst_98 = arith.constant dense<0.000000e+00> : vector<8x5xf32>
    %203 = tpu.matmul %7, %199, %cst_98 {dimension_numbers = #tpu.dot_dimension_numbers<[1], [0], [0], [1], [0, 0, 1, 1], [], []>} : vector<8x16xf32>, vector<16x5xf32>, vector<8x5xf32> -> vector<8x5xf32>
    %204 = arith.mulf %150, %127 : vector<8x5xf32>
    %cst_99 = arith.constant dense<0.000000e+00> : vector<8xf32>
    %205 = vector.multi_reduction <add>, %204, %cst_99 [1] : vector<8x5xf32> to vector<8xf32>
    %206 = vector.shape_cast %205 : vector<8xf32> to vector<8x1xf32>
    %cst_100 = arith.constant dense<0.000000e+00> : vector<8x5xf32>
    %207 = tpu.matmul %8, %203, %cst_100 {dimension_numbers = #tpu.dot_dimension_numbers<[1], [0], [0], [1], [0, 0, 1, 1], [], []>} : vector<8x8xf32>, vector<8x5xf32>, vector<8x5xf32> -> vector<8x5xf32>
    %c80 = arith.constant 80 : index
    %c0_101 = arith.constant 0 : index
    %208 = vector.load %arg1[%c80, %c0_101] : memref<168x128xf32, #tpu.memory_space<vmem>>, vector<8x16xf32>
    %cst_102 = arith.constant dense<0.000000e+00> : vector<8x1xf32>
    %209 = tpu.matmul %208, %202, %cst_102 {dimension_numbers = #tpu.dot_dimension_numbers<[1], [0], [0], [1], [0, 0, 1, 1], [], []>} : vector<8x16xf32>, vector<16x1xf32>, vector<8x1xf32> -> vector<8x1xf32>
    %c72 = arith.constant 72 : index
    %c0_103 = arith.constant 0 : index
    %210 = vector.load %arg1[%c72, %c0_103] : memref<168x128xf32, #tpu.memory_space<vmem>>, vector<8x8xf32>
    %cst_104 = arith.constant dense<0.000000e+00> : vector<8x1xf32>
    %211 = tpu.matmul %210, %206, %cst_104 {dimension_numbers = #tpu.dot_dimension_numbers<[1], [0], [0], [1], [0, 0, 1, 1], [], []>} : vector<8x8xf32>, vector<8x1xf32>, vector<8x1xf32> -> vector<8x1xf32>
    %cst_105 = arith.constant dense<0.000000e+00> : vector<8x5xf32>
    %212 = tpu.matmul %8, %150, %cst_105 {dimension_numbers = #tpu.dot_dimension_numbers<[1], [0], [0], [1], [0, 0, 1, 1], [], []>} : vector<8x8xf32>, vector<8x5xf32>, vector<8x5xf32> -> vector<8x5xf32>
    %213 = vector.broadcast %209 : vector<8x1xf32> to vector<8x5xf32>
    %214 = arith.addf %207, %213 : vector<8x5xf32>
    %215 = vector.broadcast %211 : vector<8x1xf32> to vector<8x5xf32>
    %216 = arith.addf %215, %212 : vector<8x5xf32>
    %217 = arith.addf %214, %216 : vector<8x5xf32>
    %c0_106 = arith.constant 0 : index
    %c0_107 = arith.constant 0 : index
    %218 = vector.load %arg3[%c0_106, %c0_107] : memref<8x128xf32, #tpu.memory_space<vmem>>, vector<8x5xf32>
    tpu.vector_store %arg3[%c0_106, %c0_107], %117 {strides = array<i32>} : memref<8x128xf32, #tpu.memory_space<vmem>>, vector<8x5xf32>,
    %c0_108 = arith.constant 0 : index
    %c5 = arith.constant 5 : index
    %219 = vector.load %arg3[%c0_108, %c5] : memref<8x128xf32, #tpu.memory_space<vmem>>, vector<8x32xf32>
    tpu.vector_store %arg3[%c0_108, %c5], %58 {strides = array<i32>} : memref<8x128xf32, #tpu.memory_space<vmem>>, vector<8x32xf32>,
    %c0_109 = arith.constant 0 : index
    %c37 = arith.constant 37 : index
    %220 = vector.load %arg3[%c0_109, %c37] : memref<8x128xf32, #tpu.memory_space<vmem>>, vector<8x32xf32>
    tpu.vector_store %arg3[%c0_109, %c37], %56 {strides = array<i32>} : memref<8x128xf32, #tpu.memory_space<vmem>>, vector<8x32xf32>,
    %cst_110 = arith.constant 0.000000e+00 : f32
    %221 = vector.broadcast %cst_110 : f32 to vector<8x59xf32>
    %c0_111 = arith.constant 0 : index
    %c69 = arith.constant 69 : index
    %222 = vector.load %arg3[%c0_111, %c69] : memref<8x128xf32, #tpu.memory_space<vmem>>, vector<8x59xf32>
    tpu.vector_store %arg3[%c0_111, %c69], %221 {strides = array<i32>} : memref<8x128xf32, #tpu.memory_space<vmem>>, vector<8x59xf32>,
    %c0_112 = arith.constant 0 : index
    %c0_113 = arith.constant 0 : index
    %223 = vector.load %arg4[%c0_112, %c0_113] : memref<8x128xf32, #tpu.memory_space<vmem>>, vector<8x5xf32>
    tpu.vector_store %arg4[%c0_112, %c0_113], %217 {strides = array<i32>} : memref<8x128xf32, #tpu.memory_space<vmem>>, vector<8x5xf32>,
    %cst_114 = arith.constant 0.000000e+00 : f32
    %224 = vector.broadcast %cst_114 : f32 to vector<8x123xf32>
    %c0_115 = arith.constant 0 : index
    %c5_116 = arith.constant 5 : index
    %225 = vector.load %arg4[%c0_115, %c5_116] : memref<8x128xf32, #tpu.memory_space<vmem>>, vector<8x123xf32>
    tpu.vector_store %arg4[%c0_115, %c5_116], %224 {strides = array<i32>} : memref<8x128xf32, #tpu.memory_space<vmem>>, vector<8x123xf32>,
    return
  }
}

</mosaic_0001>

<bundles_post_ra>
// kernel: _lambda_.1
= control target key start
LH: loop header
LB: loop body
LE: loop exit
PB: predicated region body
PF: predicated region fallthrough
CT: control target
= control target key end

     0   :  { %10 = vsyncpa [#allocation3], 0  ;;  %s4424_s0 = inlined_call_operand.vmem [shape: f32[16,128], index: 0, kind: input, shape index: {}]   ;;  %s4425_s1 = inlined_call_operand.hbm [shape: f32[168,128], index: 1, kind: input, shape index: {}]   ;;  %s4426_s2 = inlined_call_operand.hbm [shape: f32[648,128], index: 2, kind: input, shape index: {}]   ;;  %s4427_s3 = inlined_call_operand.vmem [shape: f32[8,128], index: 3, kind: output, shape index: {0}]   ;;  %s4428_s4 = inlined_call_operand.vmem [shape: f32[8,128], index: 4, kind: output, shape index: {1}]  }
   0x1   :  { %11 = vsyncpa [#allocation5], 0  ;;  %s4065_s15 = smov [#allocation2]   ;;  %s4017_s19 = scalar_lea.hbm %s4425_s1, 2688 }
   0x2   :  { %s19_s16 = sshll.u32 %s4065_s15, 4  ;;  %p4018_p0 = scmp.ne.s32.totalorder %s4425_s1, %s4017_s19  ;;  %s20_s16 = int_to_ptr.vmem [resolvable:$true] %s19_s16 }
   0x3   :  { %p4021_p1 = scmp.lt.u32.totalorder %s4017_s19, %s4425_s1 }
   0x5   :  { %p4023_p2 = pnand %p4021_p1, %p4018_p0 }
   0x7   :  { %4026 = shalt.err (!%p4023_p2)
}
   0x8   :  { %s4027_s24 = scalar_lea.vmem %s20_s16, 2688  ;;  %p4032_p4 = scmp.lt.s32.totalorder %s20_s16, %s20_s16 }
   0x9   :  { %p4028_p3 = scmp.ne.s32.totalorder %s20_s16, %s4027_s24  ;;  %p4033_p5 = scmp.lt.s32.totalorder %s4027_s24, %s4027_s24 }
   0xb   :  { %p4034_p6 = por %p4033_p5, %p4032_p4 }
   0xd   :  { %p4035_p7 = pnand %p4034_p6, %p4028_p3 }
   0xf   :  { %4038 = shalt.err (!%p4035_p7)
}
  0x10   :  { %s4066_s25 = smov 128   ;;  %s4067_s26 = smov 8  }
  0x11   :  { %25 = dma.hbm_to_vmem [thread:$0]  %s4425_s1, 2688, %s20_s16, [#allocation3], %s4066_s25, %s4066_s25, %s4067_s26  }
  0x12   :  { %s4068_s29 = smov [#allocation4]   ;;  %s4039_s7 = scalar_lea.hbm %s4426_s2, 10368 }
  0x13   :  { %s31_s30 = sshll.u32 %s4068_s29, 4  ;;  %p4040_p8 = scmp.ne.s32.totalorder %s4426_s2, %s4039_s7  ;;  %s32_s30 = int_to_ptr.vmem [resolvable:$true] %s31_s30 }
  0x14   :  { %p4043_p9 = scmp.lt.u32.totalorder %s4039_s7, %s4426_s2 }
  0x16   :  { %p4045_p10 = pnand %p4043_p9, %p4040_p8 }
  0x18   :  { %4048 = shalt.err (!%p4045_p10)
}
  0x19   :  { %s4049_s12 = scalar_lea.vmem %s32_s30, 10368  ;;  %p4054_p12 = scmp.lt.s32.totalorder %s32_s30, %s32_s30 }
  0x1a   :  { %p4050_p11 = scmp.ne.s32.totalorder %s32_s30, %s4049_s12  ;;  %p4055_p13 = scmp.lt.s32.totalorder %s4049_s12, %s4049_s12 }
  0x1c   :  { %p4056_p0 = por %p4055_p13, %p4054_p12 }
  0x1e   :  { %p4057_p1 = pnand %p4056_p0, %p4050_p11 }
  0x20   :  { %4060 = shalt.err (!%p4057_p1)
}
  0x21   :  { %37 = dma.hbm_to_vmem [thread:$0]  %s4426_s2, 10368, %s32_s30, [#allocation5], %s4066_s25, %s4066_s25, %s4067_s26  }
  0x22   :  { %4061 = dma.done.wait [#allocation3], 2688  }
  0x23   :  { %4062 = vsyncadd [#allocation3], 4294964608 }
  0x24   :  { %4063 = dma.done.wait [#allocation5], 10368  }
  0x25   :  { %4064 = vsyncadd [#allocation5], 4294956928  ;;  %v4069_v0 = vmov 0.0   ;;  %vm4070_vm0 = vmmov 0   ;;  %vm214_vm1 = vcmask 1041408   ;;  %vm55_vm2 = vcmask 64512  }
  0x26   :  { %3525 = vmatprep.subr.mxu0 %v4069_v0  ;;  %3527 = vmatprep.mubr.msk.f32.mxu0 %vm4070_vm0, %v4069_v0  ;;  %v45_v1 = vld [vmem:[%s4424_s0 + $0x8] sm:$0xff]  ;;  %v4139_v2 = vld [vmem:[#allocation2] sm:$0xff]  ;;  %v130_v4 = vld [vmem:[#allocation4 + $0x8] sm:$0x3]  ;;  %vm4071_vm3 = vmmov 1   ;;  %v4072_v5 = vmov 0.0|0.0  }
  0x27   :  { %3530 = vmatprep.subr.mxu1 %v4069_v0  ;;  %3532 = vmatprep.mubr.msk.f32.mxu1 %vm4070_vm0, %v4069_v0  ;;  %v129_v3 = vld [vmem:[#allocation4] sm:$0xff]  ;;  %vm3837_vm4 = vmpackc.low %vm214_vm1, %vm4071_vm3  ;;  %v131_v7 = vld [vmem:[#allocation4 + $0x10] sm:$0x1f]  ;;  %vm136_vm5 = vcmask 1044480   ;;  %vm210_vm6 = vcmask 80896   ;;  %vm132_vm7 = vcmask 39936  }
  0x28   :  { %3526 = vmatpush3.msra.mxu0 %v45_v1  ;;  %v3836_v6 = vpack.c.bf16 %v130_v4, %v129_v3  ;;  %v44_v8 = vld [vmem:[%s4424_s0] sm:$0xff]  ;;  %3531 = vmatpush3.msk.msra.mxu1 %vm136_vm5, %v131_v7  ;;  %v295_v9 = vld [vmem:[#allocation4 + $0x20] sm:$0xff]  ;;  %v296_v10 = vld [vmem:[#allocation4 + $0x28] sm:$0xff]  ;;  %s4073_s0 = smov 118   ;;  %vm392_vm8 = vcmask 261120   ;;  %vm308_vm9 = vcmask 523264  }
  0x29   :  { %3528 = vmatmul.mubr.msk.f32.vlgmr.msra.gmra.mrb[0].mxu0 %vm55_vm2, %v4139_v2  ;;  %3835 = vmatprep.subr.bf16.mxu0 %v4072_v5  ;;  %v3840_v11 = vpack.c.bf16 %v296_v10, %v295_v9  ;;  %v297_v12 = vld [vmem:[#allocation4 + $0x30] sm:$0xff]  ;;  %v298_v13 = vld [vmem:[#allocation4 + $0x38] sm:$0xff]  ;;  %v299_v17 = vld [vmem:[#allocation4 + $0x40] sm:$0xff]  ;;  %s4074_s17 = smov 64   ;;  %s4075_s18 = smov 32   ;;  %vm925_vm10 = vcmask 1043456  }
  0x2a   :  { %3539 = vmatprep.mubr.msk.f32.mxu0 %vm4070_vm0, %v4069_v0  ;;  %3838 = vmatpush3.bf16.msk.msra.mxu0 %vm3837_vm4, %v3836_v6  ;;  %v3843_v16 = vpack.c.bf16 %v298_v13, %v297_v12  ;;  %v300_v18 = vld [vmem:[#allocation4 + $0x48] sm:$0xff]  ;;  %v301_v22 = vld [vmem:[#allocation4 + $0x50] sm:$0xff]  ;;  %v302_v23 = vld [vmem:[#allocation4 + $0x58] sm:$0xff]  ;;  %s4076_s19 = smov 116   ;;  %vm920_vm12 = vcmask 97280   ;;  %vm1191_vm13 = vcmask 130048  }
  0x2b   :  { %3851 = vmatprep.subr.bf16.mxu0 %v4072_v5  ;;  %3839 = vmatprep.subr.bf16.mxu1 %v4072_v5  ;;  %v3846_v19 = vpack.c.bf16 %v300_v18, %v299_v17  ;;  %v3849_v24 = vpack.c.bf16 %v302_v23, %v301_v22  ;;  %v386_v25 = vld [vmem:[#allocation4 + $0x88] sm:$0xff]  ;;  %v387_v26 = vld [vmem:[#allocation4 + $0x90] sm:$0xff]  ;;  %v388_v27 = vld [vmem:[#allocation4 + $0x98] sm:$0xff]  ;;  %s4077_s22 = smov 96   ;;  %vm2707_vm14 = vcmask 1040384   ;;  %vm2700_vm1 = vcmask 203776  }
  0x2c   :  { %390 = vrot.lane.b32.xlu0 %v44_v8, %s4073_s0  ;;  %v3852_v28 = vpack.c.bf16 %v387_v26, %v386_v25  ;;  %v389_v29 = vld [vmem:[#allocation4 + $0xa0] sm:$0xff]  ;;  %v382_v31 = vld [vmem:[#allocation4 + $0x68] sm:$0xff]  ;;  %v383_v32 = vld [vmem:[#allocation4 + $0x70] sm:$0xff]  ;;  %s4079_s23 = smov 37   ;;  %s4080_s24 = smov 5   ;;  %vm3267_vm4 = vcmask 1048104  }
  0x2d   :  { %3540 = vmatmul.mubr.msk.f32.vlgmr.msra.gmra.mrb[2].mxu0 %vm210_vm6, %v44_v8  ;;  %v3855_v30 = vpack.c.bf16 %v389_v29, %v388_v27  ;;  %v3858_v33 = vpack.c.bf16 %v383_v32, %v382_v31  ;;  %v3287_v36 = vld [vmem:[#allocation4 + $0x18] ss:$0 sm:$0xff]  ;;  %v385_v42 = vld [vmem:[#allocation4 + $0x80] sm:$0xff]  ;;  %v3292_v51 = vld [vmem:[#allocation4 + $0xa8] ss:$0 sm:$0xff] }
  0x2e   :  { %3569 = vmatprep.mubr.msk.f32.mxu0 %vm4070_vm0, %v4069_v0  ;;  %3853 = vmatpush3.bf16.msra.mxu0 %v3852_v28  ;;  %v384_v41 = vld [vmem:[#allocation4 + $0x78] sm:$0xff]  ;;  %v3288_v46 = vld [vmem:[#allocation4 + $0x60] ss:$0 sm:$0xff]  ;;  %v570_v3 = vld [vmem:[#allocation4 + $0xb0] sm:$0xff] }
  0x2f   :  { %3854 = vmatprep.subr.bf16.mxu0 %v4072_v5  ;;  %v3861_v43 = vpack.c.bf16 %v385_v42, %v384_v41  ;;  %v571_v4 = vld [vmem:[#allocation4 + $0xb8] sm:$0xff]  ;;  %v572_v6 = vld [vmem:[#allocation4 + $0xc0] sm:$0xff]  ;;  %v573_v8 = vld [vmem:[#allocation4 + $0xc8] sm:$0xff] }
  0x30   :  { %v3864_v7 = vpack.c.bf16 %v571_v4, %v570_v3  ;;  %v3867_v9 = vpack.c.bf16 %v573_v8, %v572_v6  ;;  %v4200_v22 = vld [vmem:[#allocation2 + $0x30] sm:$0xff]  ;;  %vm4205_vm11 = vmpackc.low %vm925_vm10, %vm4071_vm3  ;;  %v913_v25 = vld [vmem:[#allocation4 + $0xf0] sm:$0xf] }
  0x31   :  { %v4213_v27 = vld [vmem:[#allocation2 + $0x40] sm:$0xff]  ;;  %v911_v29 = vld [vmem:[#allocation4 + $0xe0] sm:$0xf]  ;;  %v1265_v6 = vld [vmem:[#allocation4 + $0x128] sm:$0xff] }
  0x32   :  { %3856 = vmatpush3.bf16.msra.mxu0 %v3855_v30  ;;  %v910_v28 = vld [vmem:[#allocation4 + $0xd8] sm:$0xff]  ;;  %v2333_v23 = vld [vmem:[#allocation4 + $0x260] sm:$0xff]  ;;  %vm4367_vm15 = vmpackc.low %vm2707_vm14, %vm4071_vm3  ;;  %vm3265_vm3 = vcmask 564520  }
  0x33   :  { %3857 = vmatprep.subr.bf16.mxu0 %v4072_v5  ;;  %v3875_v30 = vpack.c.bf16 %v911_v29, %v910_v28  ;;  %v1428_v28 = vld [vmem:[#allocation4 + $0x158] sm:$0xff]  ;;  %v1429_v29 = vld [vmem:[#allocation4 + $0x160] sm:$0xff] }
  0x9e   :  { %v391_v34 = vpop.permute.xlu0 %390 }
  0x9f   :  { %3570 = vmatmul.mubr.msk.f32.vlgmr.msra.gmra.mrb[4].mxu0 %vm392_vm8, %v391_v34 }
  0xa0   :  { %3859 = vmatpush3.bf16.msra.mxu0 %v3858_v33  ;;  %3580 = vmatprep.mubr.msk.f32.mxu0 %vm4070_vm0, %v4069_v0 }
  0xa1   :  { %3860 = vmatprep.subr.bf16.mxu0 %v4072_v5 }
  0xa4   :  { %3862 = vmatpush3.bf16.msra.mxu0 %v3861_v43 }
  0xa5   :  { %3594 = vmatprep.subr.mxu0 %v4069_v0 }
  0xfc   :  { %v125_v14 = vpop.f32.mrb[0].mxu0 }
  0xfd   :  { %v3529_v15 = vpop.f32.mrb[1].mxu0  ;;  %3533 = vmatmul.mubr.msk.f32.vlgmr.msra.gmra.mrb[0].mxu1 %vm132_vm7, %v125_v14 }
  0xfe   :  { %3841 = vmatpush3.bf16.msra.mxu1 %v3840_v11  ;;  %3558 = vmatprep.mubr.msk.f32.mxu1 %vm4070_vm0, %v4069_v0  ;;  %v4182_v15 = vld [vmem:[#allocation2 + $0x18] sm:$0xff] }
  0xff   :  { %3842 = vmatprep.subr.bf16.mxu1 %v4072_v5 }
 0x100   :  { %v284_v20 = vpop.f32.mrb[2].mxu0 }
 0x101   :  { %v3541_v21 = vpop.f32.mrb[3].mxu0 }
 0x102   :  { %3844 = vmatpush3.bf16.msra.mxu1 %v3843_v16  ;;  %v3294_v16 = vld [vmem:[#allocation4 + $0xd0] ss:$0 sm:$0xff]  ;;  %v4192_v21 = vld [vmem:[#allocation2 + $0x28] sm:$0xff] }
 0x103   :  { %3845 = vmatprep.subr.bf16.mxu1 %v4072_v5 }
 0x106   :  { %3847 = vmatpush3.bf16.msra.mxu1 %v3846_v19 }
 0x107   :  { %3848 = vmatprep.subr.bf16.mxu1 %v4072_v5 }
 0x10a   :  { %3850 = vmatpush3.bf16.msra.mxu1 %v3849_v24  ;;  %v912_v24 = vld [vmem:[#allocation4 + $0xe8] sm:$0xff] }
 0x10b   :  { %3863 = vmatprep.subr.bf16.mxu1 %v4072_v5  ;;  %v3869_v26 = vpack.c.bf16 %v913_v25, %v912_v24  ;;  %v1426_v24 = vld [vmem:[#allocation4 + $0x148] sm:$0xff]  ;;  %v1427_v25 = vld [vmem:[#allocation4 + $0x150] sm:$0xff] }
 0x172   :  { %v461_v44 = vpop.f32.mrb[4].mxu0 }
 0x173   :  { %v3571_v45 = vpop.f32.mrb[5].mxu0 }
 0x174   :  { %v1103_v45 = vld [vmem:[#allocation4 + $0x110] sm:$0xff] }
 0x1d0   :  { %v206_v35 = vpop.f32.mrb[0].mxu1 }
 0x1d1   :  { %v285_v37 = vadd.f32 %v284_v20, %v206_v35  ;;  %v3534_v38 = vpop.f32.mrb[1].mxu1  ;;  %v4188_v20 = vld [vmem:[#allocation2 + $0x20] sm:$0xff] }
 0x1d3   :  { %v293_v39 = vadd.f32 %v3287_v36, %v285_v37 }
 0x1d5   :  { %v294_v40 = vmax.f32 %v293_v39, 0.0  ;;  %v1101_v39 = vld [vmem:[#allocation4 + $0x100] sm:$0xff] }
 0x1d7   :  { %3559 = vmatmul.mubr.msk.f32.vlgmr.msra.gmra.mrb[2].mxu1 %vm308_vm9, %v294_v40  ;;  %v1102_v40 = vld [vmem:[#allocation4 + $0x108] sm:$0xff] }
 0x1d8   :  { %3591 = vmatprep.mubr.msk.f32.mxu1 %vm4070_vm0, %v4069_v0  ;;  %3865 = vmatpush3.bf16.msra.mxu1 %v3864_v7  ;;  %v3881_v41 = vpack.c.bf16 %v1102_v40, %v1101_v39  ;;  %v1266_v7 = vld [vmem:[#allocation4 + $0x130] sm:$0xf]  ;;  %v1681_v39 = vld [vmem:[#allocation4 + $0x1a8] sm:$0xff] }
 0x1d9   :  { %3866 = vmatprep.subr.bf16.mxu1 %v4072_v5  ;;  %v1682_v40 = vld [vmem:[#allocation4 + $0x1b0] sm:$0xf] }
 0x1dc   :  { %3868 = vmatpush3.bf16.msra.mxu1 %v3867_v9  ;;  %v4260_v9 = vld [vmem:[#allocation2 + $0x38] sm:$0xff] }
 0x2aa   :  { %v378_v47 = vpop.f32.mrb[2].mxu1 }
 0x2ab   :  { %v379_v48 = vadd.f32 %v3288_v46, %v378_v47  ;;  %v3560_v49 = vpop.f32.mrb[3].mxu1  ;;  %v1104_v46 = vld [vmem:[#allocation4 + $0x118] sm:$0xff]  ;;  %v48_v47 = vld [vmem:[#allocation2 + $0x10] sm:$0xff] }
 0x2ad   :  { %3581 = vmatmul.mubr.msk.f32.vlgmr.msra.gmra.mrb[6].mxu0 %vm392_vm8, %v379_v48  ;;  %v3885_v48 = vpack.c.bf16 %v1104_v46, %v1103_v45  ;;  %v3319_v45 = vld [vmem:[#allocation4 + $0x168] ss:$0 sm:$0xff] }
 0x2ae   :  { %3596 = vmatprep.mubr.msk.f32.mxu0 %vm4070_vm0, %v4069_v0 }
 0x380   :  { %v534_v50 = vpop.f32.mrb[6].mxu0 }
 0x381   :  { %v535_v52 = vadd.f32 %v534_v50, %v461_v44  ;;  %v3582_v53 = vpop.f32.mrb[7].mxu0  ;;  %v47_v44 = vld [vmem:[#allocation2 + $0x8] sm:$0xff] }
 0x383   :  { %v543_v54 = vadd.f32 %v3292_v51, %v535_v52 }
 0x385   :  { %4005 = vtanh.f32 %v543_v54  ;;  %v3293_v56 = vmul.f32 -1.442695, %v543_v54 }
 0x387   :  { %4007 = vpow2.f32 %v3293_v56 }
 0x38f   :  { %v4006_v55 = vpop.eup %4005 }
 0x390   :  { %554 = vrot.lane.b32.xlu0 %v4006_v55, %s4074_s17 }
 0x391   :  { %v4008_v57 = vpop.eup %4007 }
 0x392   :  { %v547_v58 = vadd.f32 1.0, %v4008_v57 }
 0x394   :  { %4009 = vrcp.f32 %v547_v58 }
 0x39e   :  { %v4010_v59 = vpop.eup %4009 }
 0x39f   :  { %v552_v62 = vmul.f32 %v4010_v59, %v391_v34 }
 0x402   :  { %v555_v60 = vpop.permute.xlu0 %554 }
 0x403   :  { %v557_v61 = vmul.f32 %v4010_v59, %v555_v60 }
 0x405   :  { %559 = vrot.lane.b32.xlu1 %v557_v61, %s4075_s18  ;;  %v3311_v61 = vld [vmem:[#allocation4 + $0x120] ss:$0 sm:$0xff] }
 0x477   :  { %v560_v63 = vpop.permute.xlu1 %559 }
 0x478   :  { %v4174_v1 = vadd.f32 %v560_v63, %v552_v62 }
 0x47a   :  { %4011 = vtanh.f32 %v4174_v1 }
 0x484   :  { %v4012_v10 = vpop.eup %4011 }
 0x485   :  { %565 = vrot.lane.b32.xlu1 %v4012_v10, %s4074_s17  ;;  %v3893_v10 = vpack.c.bf16 %v1266_v7, %v1265_v6  ;;  %v1843_v6 = vld [vmem:[#allocation4 + $0x1d0] sm:$0xff]  ;;  %v1844_v7 = vld [vmem:[#allocation4 + $0x1d8] sm:$0xff] }
 0x4f7   :  { %v566_v11 = vpop.permute.xlu1 %565 }
 0x4f8   :  { %v4178_v12 = vmul.f32 %v4010_v59, %v566_v11 }
 0x4fa   :  { %v569_v13 = vmax.f32 %v4178_v12, 0.0 }
 0x4fc   :  { %580 = vrot.lane.b32.xlu0 %v569_v13, %s4075_s18  ;;  %v1267_v13 = vld [vmem:[#allocation4 + $0x138] sm:$0xff] }
 0x56e   :  { %v581_v14 = vpop.permute.xlu0 %580 }
 0x56f   :  { %3592 = vmatmul.mubr.msk.f32.vlgmr.msra.gmra.mrb[4].mxu1 %vm392_vm8, %v581_v14 }
 0x570   :  { %3612 = vmatprep.mubr.msk.f32.mxu1 %vm55_vm2, %v4182_v15 }
 0x642   :  { %v650_v17 = vpop.f32.mrb[4].mxu1 }
 0x643   :  { %v4186_v18 = vadd.f32 %v3294_v16, %v650_v17  ;;  %v3593_v19 = vpop.f32.mrb[5].mxu1 }
 0x645   :  { %3595 = vmatpush3.msra.mxu0 %v4186_v18  ;;  %3610 = vmatprep.subr.mxu1 %v4186_v18 }
 0x646   :  { %3611 = vmatpush3.msra.mxu1 %v4186_v18  ;;  %3599 = vmatprep.subr.mxu0 %v4069_v0 }
 0x647   :  { %3613 = vmatmul.mubr.msk.f32.vlgmr.msra.gmra.mrb[6].mxu1 %vm55_vm2, %v4188_v20  ;;  %3871 = vmatprep.subr.msk.bf16.mxu1 %vm4205_vm11, %v3869_v26 }
 0x648   :  { %3615 = vmatprep.mubr.msk.f32.mxu1 %vm55_vm2, %v4192_v21  ;;  %3874 = vmatpush3.bf16.msk.msra.mxu1 %vm4205_vm11, %v3869_v26  ;;  %v3897_v26 = vpack.c.bf16 %v1427_v25, %v1426_v24  ;;  %v3329_v25 = vld [vmem:[#allocation4 + $0x1b8] ss:$0 sm:$0xff] }
 0x649   :  { %3597 = vmatmul.mubr.msk.f32.vlgmr.msra.gmra.mrb[8].mxu0 %vm55_vm2, %v4213_v27  ;;  %3877 = vmatprep.subr.msk.bf16.mxu1 %vm4205_vm11, %v3875_v30 }
 0x64a   :  { %3601 = vmatprep.mubr.msk.f32.mxu0 %vm4070_vm0, %v4069_v0 }
 0x64b   :  { %3616 = vmatmul.mubr.msk.f32.gmra.mrb[8].mxu1 %vm55_vm2, %v4200_v22 }
 0x71a   :  { %v4221_v31 = vpop.f32.mrb[6].mxu1 }
 0x71b   :  { %v4223_v32 = vpop.f32.mrb[7].mxu1 }
 0x71c   :  { %v723_v42 = vpop.f32.mrb[8].mxu0 }
 0x71d   :  { %v3598_v43 = vpop.f32.mrb[9].mxu0  ;;  %3600 = vmatpush3.msra.mxu0 %v723_v42  ;;  %v3906_v42 = vpack.c.bf16 %v1682_v40, %v1681_v39  ;;  %v1927_v39 = vld [vmem:[#allocation4 + $0x200] sm:$0xff] }
 0x71e   :  { %v4225_v33 = vpop.f32.mrb[8].mxu1  ;;  %3602 = vmatmul.mubr.msk.f32.vlgmr.msra.gmra.mrb[10].mxu0 %vm55_vm2, %v4139_v2  ;;  %3882 = vmatprep.subr.bf16.mxu0 %v3881_v41  ;;  %v3310_v2 = vld [vmem:[#allocation4 + $0xf8] ss:$0 sm:$0xff] }
 0x71f   :  { %918 = vrot.lane.b32.xlu0 %v4225_v33, %s4076_s19  ;;  %v4228_v34 = vpop.f32.mrb[9].mxu1  ;;  %3604 = vmatprep.mubr.msk.f32.mxu0 %vm4070_vm0, %v4069_v0 }
 0x720   :  { %916 = vrot.lane.b32.xlu1 %v4228_v34, %s4076_s19  ;;  %3884 = vmatpush3.bf16.msra.mxu0 %v3881_v41 }
 0x721   :  { %3886 = vmatprep.subr.bf16.mxu0 %v3885_v48 }
 0x722   :  { %3605 = vmatmul.mubr.msk.f32.gmra.mrb[12].mxu0 %vm55_vm2, %v47_v44  ;;  %v1508_v44 = vld [vmem:[#allocation4 + $0x170] sm:$0xff] }
 0x723   :  { %1008 = vrot.lane.b32.xlu0 %v4221_v31, %s4076_s19  ;;  %3607 = vmatprep.mubr.msk.f32.mxu0 %vm4070_vm0, %v4069_v0 }
 0x724   :  { %1006 = vrot.lane.b32.xlu1 %v4223_v32, %s4076_s19  ;;  %3888 = vmatpush3.bf16.msra.mxu0 %v3885_v48 }
 0x725   :  { %3889 = vmatprep.subr.bf16.mxu0 %v4072_v5 }
 0x726   :  { %3608 = vmatmul.mubr.msk.f32.gmra.mrb[14].mxu0 %vm55_vm2, %v48_v47 }
 0x728   :  { %1342 = vrot.lane.b32.xlu1 %v4186_v18, %s4076_s19 }
 0x791   :  { %v919_v36 = vpop.permute.xlu0 %918 }
 0x792   :  { %v917_v35 = vpop.permute.xlu1 %916 }
 0x793   :  { %3622 = vmatprep.mubr.msk.f32.mxu1 %vm920_vm12, %v917_v35 }
 0x794   :  { %3623 = vmatmul.mubr.msk.f32.vlgmr.msra.gmra.mrb[10].mxu1 %vm920_vm12, %v919_v36  ;;  %v3318_v36 = vld [vmem:[#allocation4 + $0x140] ss:$0 sm:$0xff] }
 0x795   :  { %3880 = vmatpush3.bf16.msk.msra.mxu1 %vm4205_vm11, %v3875_v30  ;;  %v1009_v38 = vpop.permute.xlu0 %1008  ;;  %v3900_v30 = vpack.c.bf16 %v1429_v29, %v1428_v28 }
 0x796   :  { %v1007_v37 = vpop.permute.xlu1 %1006  ;;  %3650 = vmatprep.subr.mxu1 %v4069_v0 }
 0x797   :  { %3629 = vmatprep.mubr.msk.f32.mxu1 %vm920_vm12, %v1007_v37 }
 0x79a   :  { %v1343_v11 = vpop.permute.xlu1 %1342 }
 0x79c   :  { %3630 = vmatmul.mubr.msk.f32.vlgmr.msra.gmra.mrb[10].mxu1 %vm920_vm12, %v1009_v38 }
 0x79d   :  { %3652 = vmatprep.mubr.msk.f32.mxu1 %vm4070_vm0, %v4069_v0  ;;  %3651 = vmatpush3.msra.mxu1 %v1267_v13 }
 0x79e   :  { %3896 = vmatprep.subr.bf16.mxu1 %v4072_v5 }
 0x7f1   :  { %v799_v55 = vpop.f32.mrb[10].mxu0 }
 0x7f2   :  { %v3603_v56 = vpop.f32.mrb[11].mxu0 }
 0x7f5   :  { %v4256_v57 = vpop.f32.mrb[12].mxu0 }
 0x7f6   :  { %v3606_v58 = vpop.f32.mrb[13].mxu0 }
 0x7f9   :  { %v4258_v59 = vpop.f32.mrb[14].mxu0 }
 0x7fa   :  { %v3609_v60 = vpop.f32.mrb[15].mxu0 }
 0x86f   :  { %v3631_v49 = vpop.f32.mrb[10].mxu1 }
 0x870   :  { %v1098_v50 = vadd.f32 %v3631_v49, %v3310_v2  ;;  %v1083_v51 = vpop.f32.mrb[11].mxu1 }
 0x871   :  { %v1097_v52 = vadd.f32 %v3310_v2, %v1083_v51  ;;  %v1589_v51 = vld [vmem:[#allocation4 + $0x188] sm:$0xff] }
 0x872   :  { %v1100_v54 = vmax.f32 %v1098_v50, 0.0  ;;  %v1588_v50 = vld [vmem:[#allocation4 + $0x180] sm:$0xff] }
 0x873   :  { %v1099_v53 = vmax.f32 %v1097_v52, 0.0  ;;  %v3903_v52 = vpack.c.bf16 %v1589_v51, %v1588_v50  ;;  %v3330_v50 = vld [vmem:[#allocation4 + $0x1e0] ss:$0 sm:$0xff] }
 0x875   :  { %3640 = vmatprep.mubr.msk.f32.mxu0 %vm392_vm8, %v1099_v53  ;;  %v3321_v53 = vld [vmem:[#allocation4 + $0x178] ss:$0 sm:$0xff] }
 0x876   :  { %3641 = vmatmul.mubr.msk.f32.vlgmr.msra.gmra.mrb[16].mxu0 %vm392_vm8, %v1100_v54  ;;  %v1679_v54 = vld [vmem:[#allocation4 + $0x198] sm:$0xff] }
 0x877   :  { %3647 = vmatprep.mubr.msk.f32.mxu0 %vm4070_vm0, %v4069_v0 }
 0x949   :  { %v3642_v62 = vpop.f32.mrb[16].mxu0 }
 0x94a   :  { %v1188_v63 = vadd.f32 %v3642_v62, %v3311_v61  ;;  %v1182_v3 = vpop.f32.mrb[17].mxu0 }
 0x94b   :  { %v1183_v4 = vadd.f32 %v3311_v61, %v1182_v3  ;;  %v1842_v3 = vld [vmem:[#allocation4 + $0x1c8] sm:$0xff] }
 0x94d   :  { %v3890_v8 = vpack.c.bf16 %v1188_v63, %v1183_v4  ;;  %v1841_v63 = vld [vmem:[#allocation4 + $0x1c0] sm:$0xff] }
 0x94e   :  { %v3914_v4 = vpack.c.bf16 %v1842_v3, %v1841_v63  ;;  %v2334_v3 = vld [vmem:[#allocation4 + $0x268] sm:$0xff] }
 0x94f   :  { %3891 = vmatpush3.bf16.msra.mxu0 %v3890_v8  ;;  %v3917_v8 = vpack.c.bf16 %v1844_v7, %v1843_v6 }
 0x950   :  { %3892 = vmatprep.subr.bf16.mxu0 %v4072_v5 }
 0x952   :  { %3648 = vmatmul.mubr.msk.f32.vlgmr.msra.gmra.mrb[18].mxu0 %vm1191_vm13, %v4260_v9 }
 0x953   :  { %3895 = vmatpush3.bf16.msk.msra.mxu0 %vm4205_vm11, %v3893_v10  ;;  %3659 = vmatprep.mubr.msk.f32.mxu0 %vm4070_vm0, %v4069_v0  ;;  %v2006_v10 = vld [vmem:[#allocation4 + $0x210] sm:$0xff] }
 0x954   :  { %3673 = vmatprep.subr.mxu0 %v4069_v0 }
 0x956   :  { %3660 = vmatmul.mubr.msk.f32.vlgmr.msra.gmra.mrb[20].mxu0 %vm920_vm12, %v1343_v11  ;;  %v2007_v11 = vld [vmem:[#allocation4 + $0x218] sm:$0xf] }
 0x957   :  { %3675 = vmatprep.mubr.msk.f32.mxu0 %vm4070_vm0, %v4069_v0  ;;  %3674 = vmatpush3.msra.mxu0 %v1508_v44  ;;  %v3925_v13 = vpack.c.bf16 %v2007_v11, %v2006_v10  ;;  %v3339_v10 = vld [vmem:[#allocation4 + $0x230] ss:$0 sm:$0xff] }
 0x958   :  { %3902 = vmatprep.subr.bf16.mxu0 %v4072_v5 }
 0xa25   :  { %v1261_v14 = vpop.f32.mrb[18].mxu0 }
 0xa26   :  { %3653 = vmatmul.mubr.msk.f32.vlgmr.msra.gmra.mrb[12].mxu1 %vm55_vm2, %v1261_v14  ;;  %v3649_v16 = vpop.f32.mrb[19].mxu0 }
 0xa27   :  { %3670 = vmatprep.mubr.msk.f32.mxu1 %vm4070_vm0, %v4069_v0  ;;  %3898 = vmatpush3.bf16.msra.mxu1 %v3897_v26 }
 0xa28   :  { %3899 = vmatprep.subr.bf16.mxu1 %v4072_v5 }
 0xa29   :  { %v1415_v17 = vpop.f32.mrb[20].mxu0 }
 0xa2a   :  { %v3661_v19 = vpop.f32.mrb[21].mxu0 }
 0xa2b   :  { %3901 = vmatpush3.bf16.msra.mxu1 %v3900_v30 }
 0xa2c   :  { %3905 = vmatprep.subr.bf16.mxu1 %v4072_v5 }
 0xaf9   :  { %v1337_v35 = vpop.f32.mrb[12].mxu1 }
 0xafa   :  { %v1416_v37 = vadd.f32 %v1415_v17, %v1337_v35  ;;  %v3654_v38 = vpop.f32.mrb[13].mxu1  ;;  %v1924_v35 = vld [vmem:[#allocation4 + $0x1e8] sm:$0xff] }
 0xafb   :  { %v1926_v38 = vld [vmem:[#allocation4 + $0x1f8] sm:$0xff] }
 0xafc   :  { %v1424_v41 = vadd.f32 %v3318_v36, %v1416_v37  ;;  %v1925_v36 = vld [vmem:[#allocation4 + $0x1f0] sm:$0xff]  ;;  %v3923_v40 = vpack.c.bf16 %v1927_v39, %v1926_v38 }
 0xafd   :  { %v3920_v37 = vpack.c.bf16 %v1925_v36, %v1924_v35  ;;  %v2335_v39 = vld [vmem:[#allocation4 + $0x270] sm:$0xff] }
 0xafe   :  { %v1425_v43 = vmax.f32 %v1424_v41, 0.0  ;;  %v2105_v41 = vld [vmem:[#allocation4 + $0x228] sm:$0xf] }
 0xb00   :  { %3671 = vmatmul.mubr.msk.f32.vlgmr.msra.gmra.mrb[14].mxu1 %vm392_vm8, %v1425_v43 }
 0xb01   :  { %3908 = vmatpush3.bf16.msk.msra.mxu1 %vm4205_vm11, %v3906_v42  ;;  %3689 = vmatprep.mubr.msk.f32.mxu1 %vm4070_vm0, %v4069_v0 }
 0xb02   :  { %3913 = vmatprep.subr.bf16.mxu1 %v4072_v5 }
 0xb04   :  { %3690 = vmatmul.mubr.msk.f32.vlgmr.msra.gmra.mrb[16].mxu1 %vm920_vm12, %v799_v55  ;;  %v1680_v55 = vld [vmem:[#allocation4 + $0x1a0] sm:$0xf] }
 0xb05   :  { %3707 = vmatprep.mubr.msk.f32.mxu1 %vm4070_vm0, %v4069_v0  ;;  %v3910_v61 = vpack.c.bf16 %v1680_v55, %v1679_v54  ;;  %3915 = vmatpush3.bf16.msra.mxu1 %v3914_v4 }
 0xb06   :  { %3916 = vmatprep.subr.bf16.mxu1 %v4072_v5 }
 0xb09   :  { %3918 = vmatpush3.bf16.msra.mxu1 %v3917_v8 }
 0xb0a   :  { %3927 = vmatprep.subr.msk.bf16.mxu1 %vm4205_vm11, %v3925_v13 }
 0xbd3   :  { %v1504_v46 = vpop.f32.mrb[14].mxu1 }
 0xbd4   :  { %v1505_v47 = vadd.f32 %v3319_v45, %v1504_v46  ;;  %v3672_v48 = vpop.f32.mrb[15].mxu1  ;;  %v2223_v45 = vld [vmem:[#allocation4 + $0x238] sm:$0xff]  ;;  %v2224_v46 = vld [vmem:[#allocation4 + $0x240] sm:$0xff] }
 0xbd5   :  { %v3937_v48 = vpack.c.bf16 %v2224_v46, %v2223_v45 }
 0xbd6   :  { %3676 = vmatmul.mubr.msk.f32.vlgmr.msra.gmra.mrb[22].mxu0 %vm55_vm2, %v1505_v47  ;;  %v2225_v47 = vld [vmem:[#allocation4 + $0x248] sm:$0xff] }
 0xbd7   :  { %v1755_v2 = vpop.f32.mrb[16].mxu1  ;;  %3682 = vmatprep.mubr.msk.f32.mxu0 %vm4070_vm0, %v4069_v0  ;;  %3904 = vmatpush3.bf16.msra.mxu0 %v3903_v52 }
 0xbd8   :  { %v3691_v49 = vpop.f32.mrb[17].mxu1  ;;  %3909 = vmatprep.subr.bf16.mxu0 %v4072_v5 }
 0xca9   :  { %v1583_v56 = vpop.f32.mrb[22].mxu0 }
 0xcaa   :  { %v1584_v58 = vadd.f32 %v3321_v53, %v1583_v56  ;;  %v3677_v60 = vpop.f32.mrb[23].mxu0 }
 0xcac   :  { %v1587_v62 = vmax.f32 %v1584_v58, 0.0 }
 0xcae   :  { %3683 = vmatmul.mubr.msk.f32.vlgmr.msra.gmra.mrb[24].mxu0 %vm1191_vm13, %v1587_v62 }
 0xcaf   :  { %3912 = vmatpush3.bf16.msk.msra.mxu0 %vm4205_vm11, %v3910_v61  ;;  %3696 = vmatprep.mubr.msk.f32.mxu0 %vm4070_vm0, %v4069_v0 }
 0xcb0   :  { %3919 = vmatprep.subr.bf16.mxu0 %v4072_v5 }
 0xcb2   :  { %3697 = vmatmul.mubr.msk.f32.vlgmr.msra.gmra.mrb[26].mxu0 %vm920_vm12, %v4186_v18  ;;  %v3323_v18 = vld [vmem:[#allocation4 + $0x190] ss:$0 sm:$0xff] }
 0xcb3   :  { %3718 = vmatprep.mubr.msk.f32.mxu0 %vm4070_vm0, %v4069_v0  ;;  %3921 = vmatpush3.bf16.msra.mxu0 %v3920_v37 }
 0xcb4   :  { %3922 = vmatprep.subr.bf16.mxu0 %v4072_v5 }
 0xcb7   :  { %3924 = vmatpush3.bf16.msra.mxu0 %v3923_v40  ;;  %v2336_v40 = vld [vmem:[#allocation4 + $0x278] sm:$0xff] }
 0xd81   :  { %v1664_v14 = vpop.f32.mrb[24].mxu0 }
 0xd82   :  { %v1665_v16 = vadd.f32 %v3323_v18, %v1664_v14  ;;  %v3684_v17 = vpop.f32.mrb[25].mxu0 }
 0xd84   :  { %3254 = vst.msk [vmem:[%s4427_s3] sm:$0xff] %vm132_vm7, %v1665_v16  ;;  %v1668_v19 = vsel %vm132_vm7, %v1665_v16, -inf }
 0xd85   :  { %1669 = vmax.xlane.f32.xlu0 %v1668_v19  ;;  %v1830_v24 = vpop.f32.mrb[26].mxu0 }
 0xd86   :  { %v1831_v26 = vadd.f32 %v1830_v24, %v1755_v2  ;;  %v3698_v28 = vpop.f32.mrb[27].mxu0  ;;  %v2226_v2 = vld [vmem:[#allocation4 + $0x250] sm:$0xff] }
 0xd87   :  { %v3941_v49 = vpack.c.bf16 %v2226_v2, %v2225_v47 }
 0xd88   :  { %v1839_v29 = vadd.f32 %v3329_v25, %v1831_v26 }
 0xd8a   :  { %v1840_v30 = vmax.f32 %v1839_v29, 0.0 }
 0xd8c   :  { %3708 = vmatmul.mubr.msk.f32.vlgmr.msra.gmra.mrb[18].mxu1 %vm392_vm8, %v1840_v30 }
 0xd8d   :  { %3930 = vmatpush3.bf16.msk.msra.mxu1 %vm4205_vm11, %v3925_v13  ;;  %3725 = vmatprep.mubr.msk.f32.mxu1 %vm920_vm12, %v4223_v32  ;;  %v2104_v32 = vld [vmem:[#allocation4 + $0x220] sm:$0xff] }
 0xd8e   :  { %v3931_v42 = vpack.c.bf16 %v2105_v41, %v2104_v32  ;;  %3938 = vmatprep.subr.bf16.mxu1 %v3937_v48  ;;  %v3949_v32 = vpack.c.bf16 %v2336_v40, %v2335_v39  ;;  %v2524_v41 = vld [vmem:[#allocation2 + $0xa0] sm:$0x1f] }
 0xd90   :  { %3726 = vmatmul.mubr.msk.f32.vlgmr.msra.gmra.mrb[20].mxu1 %vm920_vm12, %v4221_v31  ;;  %3933 = vmatprep.subr.msk.bf16.mxu0 %vm4205_vm11, %v3931_v42 }
 0xd91   :  { %3728 = vmatprep.mubr.msk.f32.mxu1 %vm920_vm12, %v4228_v34  ;;  %3940 = vmatpush3.bf16.msra.mxu1 %v3937_v48 }
 0xd92   :  { %3942 = vmatprep.subr.bf16.mxu1 %v3941_v49 }
 0xd94   :  { %3729 = vmatmul.mubr.msk.f32.gmra.mrb[22].mxu1 %vm920_vm12, %v4225_v33 }
 0xd95   :  { %3944 = vmatpush3.bf16.msra.mxu1 %v3941_v49 }
 0xe12   :  { %v1670_v31 = vpop.xlane.xlu0 %1669 }
 0xe13   :  { %v1671_v34 = vsub.f32 %v1665_v16, %v1670_v31 }
 0xe15   :  { %v1672_v43 = vmul.f32 1.442695, %v1671_v34 }
 0xe17   :  { %4013 = vpow2.f32 %v1672_v43 }
 0xe21   :  { %v4014_v33 = vpop.eup %4013 }
 0xe22   :  { %v1674_v44 = vsel %vm132_vm7, %v4014_v33, 0.0 }
 0xe23   :  { %1675 = vadd.xlane.f32.xlu1 %v1674_v44 }
 0xe5f   :  { %v1919_v51 = vpop.f32.mrb[18].mxu1 }
 0xe60   :  { %v1920_v52 = vadd.f32 %v3330_v50, %v1919_v51  ;;  %v3709_v53 = vpop.f32.mrb[19].mxu1  ;;  %v2696_v50 = vld [vmem:[#allocation2 + $0x78] sm:$0xff]  ;;  %v2697_v51 = vld [vmem:[#allocation2 + $0x80] sm:$0xff] }
 0xe61   :  { %v2698_v53 = vld [vmem:[#allocation2 + $0x88] sm:$0xff] }
 0xe62   :  { %v1923_v54 = vmax.f32 %v1920_v52, 0.0  ;;  %v3953_v52 = vpack.c.bf16 %v2697_v51, %v2696_v50 }
 0xe63   :  { %v3727_v55 = vpop.f32.mrb[20].mxu1 }
 0xe64   :  { %3719 = vmatmul.mubr.msk.f32.vlgmr.msra.gmra.mrb[28].mxu0 %vm392_vm8, %v1923_v54  ;;  %v2085_v56 = vpop.f32.mrb[21].mxu1  ;;  %v2699_v54 = vld [vmem:[#allocation2 + $0x90] sm:$0x1] }
 0xe65   :  { %3936 = vmatpush3.bf16.msk.msra.mxu0 %vm4205_vm11, %v3931_v42  ;;  %3735 = vmatprep.mubr.msk.f32.mxu0 %vm920_vm12, %v4256_v57  ;;  %v3945_v57 = vpack.c.bf16 %v2334_v3, %v2333_v23  ;;  %v3343_v42 = vld [vmem:[#allocation4 + $0x258] ss:$0 sm:$0xff] }
 0xe67   :  { %v3730_v58 = vpop.f32.mrb[22].mxu1  ;;  %3946 = vmatprep.subr.bf16.mxu0 %v3945_v57 }
 0xe68   :  { %3736 = vmatmul.mubr.msk.f32.vlgmr.msra.gmra.mrb[30].mxu0 %vm920_vm12, %v4258_v59  ;;  %2199 = vrot.lane.b32.xlu1 %v3730_v58, %s4077_s22  ;;  %v2095_v60 = vpop.f32.mrb[23].mxu1 }
 0xe69   :  { %2197 = vrot.lane.b32.xlu0 %v2095_v60, %s4077_s22  ;;  %3948 = vmatpush3.bf16.msra.mxu0 %v3945_v57 }
 0xe6a   :  { %3950 = vmatprep.subr.bf16.mxu0 %v3949_v32 }
 0xe6c   :  { %2211 = vrot.lane.b32.xlu1 %v3727_v55, %s4077_s22 }
 0xe6d   :  { %2209 = vrot.lane.b32.xlu0 %v2085_v56, %s4077_s22  ;;  %3952 = vmatpush3.bf16.msra.mxu0 %v3949_v32 }
 0xe6e   :  { %3774 = vmatprep.subr.msk.mxu0 %vm136_vm5, %v2524_v41 }
 0xeb0   :  { %v1676_v61 = vpop.xlane.xlu1 %1675 }
 0xeb1   :  { %4015 = vrcp.f32 %v1676_v61 }
 0xebb   :  { %v4016_v62 = vpop.eup %4015 }
 0xebc   :  { %v4333_v63 = vmul.f32 %v4016_v62, %v4014_v33 }
 0xebe   :  { %3766 = vmatprep.subr.mxu1 %v4333_v63 }
 0xeda   :  { %v2200_v4 = vpop.permute.xlu1 %2199 }
 0xedb   :  { %v2198_v59 = vpop.permute.xlu0 %2197  ;;  %v2204_v18 = vadd.f32 %v3727_v55, %v2200_v4  ;;  %v3957_v55 = vpack.c.bf16 %v2699_v54, %v2698_v53  ;;  %v3348_v4 = vld [vmem:[#allocation4 + $0x280] ss:$0 sm:$0xff] }
 0xedc   :  { %v2203_v19 = vadd.f32 %v2198_v59, %v2085_v56 }
 0xede   :  { %v2212_v8 = vpop.permute.xlu1 %2211 }
 0xedf   :  { %v2210_v11 = vpop.permute.xlu0 %2209  ;;  %v2216_v14 = vadd.f32 %v3730_v58, %v2212_v8  ;;  %v2690_v58 = vld [vmem:[#allocation2 + $0x58] sm:$0xff] }
 0xee0   :  { %v2215_v24 = vadd.f32 %v2210_v11, %v2095_v60  ;;  %v2691_v60 = vld [vmem:[#allocation2 + $0x60] sm:$0xff] }
 0xee1   :  { %v3963_v61 = vpack.c.bf16 %v2691_v60, %v2690_v58 }
 0xf37   :  { %v4336_v6 = vpop.f32.mrb[28].mxu0 }
 0xf38   :  { %v3720_v7 = vpop.f32.mrb[29].mxu0 }
 0xf3b   :  { %v3737_v13 = vpop.f32.mrb[30].mxu0 }
 0xf3c   :  { %v2192_v16 = vadd.f32 %v3737_v13, %v3339_v10  ;;  %v2186_v17 = vpop.f32.mrb[31].mxu0 }
 0xf3d   :  { %v2187_v25 = vadd.f32 %v3339_v10, %v2186_v17 }
 0xf3e   :  { %v2206_v26 = vadd.f32 %v2204_v18, %v2192_v16  ;;  %v2218_v28 = vadd.f32 %v2216_v14, %v2192_v16 }
 0xf3f   :  { %v2205_v29 = vadd.f32 %v2203_v19, %v2187_v25  ;;  %v2217_v30 = vadd.f32 %v2215_v24, %v2187_v25  ;;  %v2692_v24 = vld [vmem:[#allocation2 + $0x68] sm:$0xff]  ;;  %v2693_v25 = vld [vmem:[#allocation2 + $0x70] sm:$0x1] }
 0xf40   :  { %v2220_v36 = vmax.f32 %v2206_v26, 0.0  ;;  %v2222_v38 = vmax.f32 %v2218_v28, 0.0 }
 0xf41   :  { %v2219_v35 = vmax.f32 %v2205_v29, 0.0  ;;  %v2221_v37 = vmax.f32 %v2217_v30, 0.0  ;;  %v3967_v30 = vpack.c.bf16 %v2693_v25, %v2692_v24 }
 0xf43   :  { %3746 = vmatprep.mubr.msk.f32.mxu1 %vm392_vm8, %v2219_v35  ;;  %v3332_v35 = vld [vmem:[#allocation4 + $0x208] ss:$0 sm:$0xff] }
 0xf44   :  { %3747 = vmatmul.mubr.msk.f32.vlgmr.msra.gmra.mrb[24].mxu1 %vm392_vm8, %v2220_v36  ;;  %v2003_v36 = vadd.f32 %v3332_v35, %v4336_v6 }
 0xf45   :  { %3767 = vmatpush3.msra.mxu1 %v4333_v63  ;;  %3749 = vmatprep.mubr.msk.f32.mxu1 %vm392_vm8, %v2221_v37 }
 0xf46   :  { %3954 = vmatprep.subr.bf16.mxu1 %v3953_v52 }
 0xf48   :  { %3750 = vmatmul.mubr.msk.f32.gmra.mrb[26].mxu1 %vm392_vm8, %v2222_v38 }
 0xf49   :  { %3768 = vmatprep.mubr.msk.f32.mxu1 %vm55_vm2, %v4182_v15 }
 0xf4c   :  { %3769 = vmatmul.mubr.msk.f32.vlgmr.msra.gmra.mrb[28].mxu1 %vm55_vm2, %v4188_v20 }
 0xf4d   :  { %3771 = vmatprep.mubr.msk.f32.mxu1 %vm55_vm2, %v4192_v21  ;;  %3956 = vmatpush3.bf16.msra.mxu1 %v3953_v52 }
 0xf4e   :  { %3959 = vmatprep.subr.msk.bf16.mxu1 %vm4367_vm15, %v3957_v55 }
 0xf50   :  { %3772 = vmatmul.mubr.msk.f32.gmra.mrb[30].mxu1 %vm55_vm2, %v4200_v22  ;;  %v2609_v22 = vld [vmem:[#allocation2 + $0x98] sm:$0x1f] }
 0xf51   :  { %3962 = vmatpush3.bf16.msk.msra.mxu1 %vm4367_vm15, %v3957_v55 }
 0xf52   :  { %3964 = vmatprep.subr.bf16.mxu1 %v3963_v61 }
0x1017   :  { %v3748_v31 = vpop.f32.mrb[24].mxu1 }
0x1018   :  { %v2316_v15 = vadd.f32 %v3748_v31, %v3343_v42  ;;  %v2310_v34 = vpop.f32.mrb[25].mxu1 }
0x1019   :  { %v2311_v43 = vadd.f32 %v3343_v42, %v2310_v34 }
0x101a   :  { %v2330_v44 = vmax.f32 %v2316_v15, 0.0  ;;  %v2950_v15 = vmul.f32 %v2003_v36, %v4333_v63 }
0x101b   :  { %v2329_v20 = vmax.f32 %v2311_v43, 0.0  ;;  %v3751_v33 = vpop.f32.mrb[26].mxu1 }
0x101c   :  { %v2326_v21 = vadd.f32 %v3751_v33, %v3343_v42  ;;  %v2320_v45 = vpop.f32.mrb[27].mxu1  ;;  %v2951_v34 = vsel %vm132_vm7, %v2950_v15, 0.0 }
0x101d   :  { %v2321_v46 = vadd.f32 %v3343_v42, %v2320_v45  ;;  %3760 = vmatprep.mubr.msk.f32.mxu0 %vm392_vm8, %v2329_v20  ;;  %v4078_v45 = vmov 0  }
0x101e   :  { %3761 = vmatmul.mubr.msk.f32.vlgmr.msra.gmra.mrb[32].mxu0 %vm392_vm8, %v2330_v44  ;;  %v2332_v2 = vmax.f32 %v2326_v21, 0.0  ;;  %v2954_v44 = vld [vmem:[#allocation2 + $0x50] sm:$0xff]  ;;  %4003 = vset.pattern.permute.xlu0 %v4078_v45 }
0x101f   :  { %v2331_v47 = vmax.f32 %v2321_v46, 0.0  ;;  %3775 = vmatpush3.msk.msra.mxu0 %vm136_vm5, %v2524_v41  ;;  %v3770_v48 = vpop.f32.mrb[28].mxu1  ;;  %4004 = vset.pattern.permute.xlu1 %v4078_v45 }
0x1020   :  { %v2505_v49 = vpop.f32.mrb[29].mxu1  ;;  %3779 = vmatprep.subr.msk.mxu0 %vm136_vm5, %v2609_v22 }
0x1021   :  { %3763 = vmatprep.mubr.msk.f32.mxu0 %vm392_vm8, %v2331_v47 }
0x1022   :  { %3764 = vmatmul.mubr.msk.f32.gmra.mrb[34].mxu0 %vm392_vm8, %v2332_v2 }
0x1023   :  { %3776 = vmatprep.mubr.msk.f32.mxu0 %vm132_vm7, %v2505_v49  ;;  %v3773_v62 = vpop.f32.mrb[30].mxu1 }
0x1024   :  { %v2515_v23 = vpop.f32.mrb[31].mxu1 }
0x1026   :  { %3777 = vmatmul.mubr.msk.f32.vlgmr.msra.gmra.mrb[36].mxu0 %vm132_vm7, %v3770_v48 }
0x1027   :  { %3781 = vmatprep.mubr.msk.f32.mxu0 %vm132_vm7, %v2505_v49  ;;  %3780 = vmatpush3.msk.msra.mxu0 %vm136_vm5, %v2609_v22 }
0x1028   :  { %3973 = vmatprep.subr.bf16.mxu0 %v4072_v5 }
0x102a   :  { %3782 = vmatmul.mubr.msk.f32.vlgmr.msra.gmra.mrb[38].mxu0 %vm132_vm7, %v3770_v48 }
0x102b   :  { %3810 = vmatprep.mubr.msk.f32.mxu0 %vm4070_vm0, %v4069_v0 }
0x10f1   :  { %v3762_v3 = vpop.f32.mrb[32].mxu0 }
0x10f2   :  { %v2420_v57 = vpop.f32.mrb[33].mxu0  ;;  %v2426_v8 = vadd.f32 %v3762_v3, %v3348_v4 }
0x10f3   :  { %v2421_v10 = vadd.f32 %v3348_v4, %v2420_v57 }
0x10f5   :  { %v3765_v59 = vpop.f32.mrb[34].mxu0 }
0x10f6   :  { %v2430_v7 = vpop.f32.mrb[35].mxu0  ;;  %v2436_v16 = vadd.f32 %v3765_v59, %v3348_v4 }
0x10f7   :  { %v2431_v17 = vadd.f32 %v3348_v4, %v2430_v7 }
0x10f9   :  { %v3778_v11 = vpop.f32.mrb[36].mxu0 }
0x10fa   :  { %v2689_v13 = vmul.f32 %v3778_v11, %v2426_v8  ;;  %v2600_v18 = vpop.f32.mrb[37].mxu0 }
0x10fb   :  { %v2688_v14 = vmul.f32 %v2600_v18, %v2421_v10 }
0x10fd   :  { %v3783_v19 = vpop.f32.mrb[38].mxu0 }
0x10fe   :  { %v2695_v26 = vmul.f32 %v3783_v19, %v2436_v16  ;;  %v2679_v28 = vpop.f32.mrb[39].mxu0 }
0x10ff   :  { %v2694_v29 = vmul.f32 %v2679_v28, %v2431_v17 }
0x1101   :  { %3792 = vmatprep.mubr.msk.f32.mxu1 %vm2700_vm1, %v2694_v29 }
0x1102   :  { %3793 = vmatmul.mubr.msk.f32.vlgmr.msra.gmra.mrb[32].mxu1 %vm2700_vm1, %v2695_v26 }
0x1103   :  { %3966 = vmatpush3.bf16.msra.mxu1 %v3963_v61  ;;  %3803 = vmatprep.mubr.msk.f32.mxu1 %vm2700_vm1, %v2688_v14 }
0x1104   :  { %3969 = vmatprep.subr.msk.bf16.mxu1 %vm4367_vm15, %v3967_v30 }
0x1107   :  { %3972 = vmatpush3.bf16.msk.msra.mxu1 %vm4367_vm15, %v3967_v30 }
0x1108   :  { %3825 = vmatprep.subr.mxu1 %v4069_v0 }
0x110a   :  { %3804 = vmatmul.mubr.msk.f32.vlgmr.msra.gmra.mrb[32].mxu1 %vm2700_vm1, %v2689_v13 }
0x110b   :  { %3826 = vmatpush3.msra.mxu1 %v2003_v36  ;;  %3827 = vmatprep.mubr.msk.f32.mxu1 %vm4070_vm0, %v4069_v0 }
0x110c   :  { %3830 = vmatprep.subr.mxu1 %v4069_v0 }
0x110e   :  { %3828 = vmatmul.mubr.msk.f32.vlgmr.msra.gmra.mrb[34].mxu1 %vm55_vm2, %v4213_v27 }
0x110f   :  { %3832 = vmatprep.mubr.msk.f32.mxu1 %vm4070_vm0, %v4069_v0 }
0x11dd   :  { %v3805_v37 = vpop.f32.mrb[32].mxu1 }
0x11de   :  { %v2871_v38 = vmul.f32 0.5, %v3805_v37  ;;  %v2861_v39 = vpop.f32.mrb[33].mxu1 }
0x11df   :  { %v2870_v40 = vmul.f32 0.5, %v2861_v39 }
0x11e0   :  { %v2873_v32 = vmul.f32 %v3773_v62, %v2871_v38 }
0x11e1   :  { %v3974_v41 = vpack.c.bf16 %v2871_v38, %v2870_v40  ;;  %v2872_v6 = vmul.f32 %v2870_v40, %v2515_v23 }
0x11e2   :  { %v2877_v42 = vsel %vm132_vm7, %v2873_v32, 0.0 }
0x11e3   :  { %2878 = vadd.xlane.f32.xlu1 %v2877_v42  ;;  %3975 = vmatpush3.bf16.msra.mxu0 %v3974_v41  ;;  %v2874_v31 = vsel %vm132_vm7, %v2872_v6, 0.0 }
0x11e4   :  { %2875 = vadd.xlane.f32.xlu0 %v2874_v31  ;;  %3976 = vmatprep.subr.bf16.mxu0 %v4072_v5  ;;  %v3028_v5 = vld [vmem:[#allocation2 + $0x48] sm:$0xff] }
0x11e6   :  { %3811 = vmatmul.mubr.msk.f32.vlgmr.msra.gmra.mrb[40].mxu0 %vm1191_vm13, %v4260_v9 }
0x11e7   :  { %3817 = vmatprep.mubr.msk.f32.mxu0 %vm4070_vm0, %v4069_v0 }
0x11e8   :  { %2952 = vadd.xlane.f32.xlu0 %v2951_v34 }
0x1270   :  { %v2879_v43 = vpop.xlane.xlu1 %2878 }
0x1271   :  { %v2876_v20 = vpop.xlane.xlu0 %2875 }
0x1272   :  { %v3977_v33 = vpack.c.bf16 %v2879_v43, %v2876_v20 }
0x1274   :  { %3978 = vmatpush3.bf16.msra.mxu0 %v3977_v33 }
0x1275   :  { %3820 = vmatprep.subr.mxu0 %v4069_v0  ;;  %v2953_v63 = vpop.xlane.xlu0 %2952 }
0x1277   :  { %3818 = vmatmul.mubr.msk.f32.vlgmr.msra.gmra.mrb[42].mxu0 %vm1191_vm13, %v2954_v44 }
0x1278   :  { %3821 = vmatpush3.msra.mxu0 %v2953_v63  ;;  %3822 = vmatprep.mubr.msk.f32.mxu0 %vm4070_vm0, %v4069_v0  ;;  %vm3270_vm0 = vcmask 1047592  }
0x127b   :  { %3823 = vmatmul.mubr.msk.f32.vlgmr.msra.gmra.mrb[44].mxu0 %vm55_vm2, %v3028_v5 }
0x12b9   :  { %v2946_v9 = vpop.f32.mrb[40].mxu0 }
0x12ba   :  { %3831 = vmatpush3.msra.mxu1 %v2946_v9  ;;  %v3812_v21 = vpop.f32.mrb[41].mxu0 }
0x12bb   :  { %3833 = vmatmul.mubr.msk.f32.vlgmr.msra.gmra.mrb[34].mxu1 %vm55_vm2, %v4213_v27  ;;  %vm3259_vm2 = vcmask 302120  }
0x134a   :  { %v3024_v46 = vpop.f32.mrb[42].mxu0 }
0x134b   :  { %v3819_v22 = vpop.f32.mrb[43].mxu0  ;;  %3174 = vperm.xlu0 %4003, %v3024_v46  }
0x134e   :  { %v3098_v47 = vpop.f32.mrb[44].mxu0 }
0x134f   :  { %3249 = vperm.xlu1 %4004, %v3098_v47   ;;  %v3824_v48 = vpop.f32.mrb[45].mxu0 }
0x1353   :  { %3256 = vrot.lane.b32.xlu1 %v4178_v12, %s4079_s23 }
0x1357   :  { %3262 = vrot.lane.b32.xlu1 %v4174_v1, %s4080_s24 }
0x138e   :  { %v3243_v2 = vpop.f32.mrb[34].mxu1 }
0x138f   :  { %v3834_v49 = vpop.f32.mrb[35].mxu1 }
0x13ca   :  { %v3175_v50 = vpop.permute.xlu0 %3174 }
0x13cb   :  { %v3244_v51 = vadd.f32 %v3243_v2, %v3175_v50 }
0x13ce   :  { %v3250_v27 = vpop.permute.xlu1 %3249 }
0x13cf   :  { %v3980_v52 = vadd.f32 %v3250_v27, %v3244_v51 }
0x13d1   :  { %3269 = vst.msk [vmem:[%s4428_s4] sm:$0xff] %vm132_vm7, %v3980_v52 }
0x13d2   :  { %3271 = vst.msk [vmem:[%s4428_s4] sm:$0xff] %vm3270_vm0, %v4069_v0  ;;  %v3257_v12 = vpop.permute.xlu1 %3256 }
0x13d3   :  { %3260 = vst.msk [vmem:[%s4427_s3] sm:$0xff] %vm3259_vm2, %v3257_v12 }
0x13d6   :  { %v3263_v1 = vpop.permute.xlu1 %3262 }
0x13d7   :  { %3266 = vst.msk [vmem:[%s4427_s3] sm:$0xff] %vm3265_vm3, %v3263_v1 }
0x13d8   :  { %3268 = vst.msk [vmem:[%s4427_s3] sm:$0xff] %vm3267_vm4, %v4069_v0 }
0x13d9   :  { %3280 = vsyncpa [#allocation3], 1 }
0x13da   :  { %3281 = vsyncpa [#allocation5], 1 }

</bundles_post_ra>
